<compile_context>
chip_gen: v6e
topology: v6e:2x2x1
jax: 0.10.0
libtpu: 0.0.40
codegen_flags: <defaults>
</compile_context>

<pallas_src>
from functools import partial

import jax
import jax.numpy as jnp
from jax.experimental import pallas as pl
from jax.experimental.pallas import tpu as pltpu

_INV_SQRT2 = 0.7071067811865476
_OUT_PAD = 128          # lane-dense padded width for the 3-wide output head


def _round_up(x, m):
    return (x + m - 1) // m * m


def _layer_norm(x, gamma, beta, eps=1e-5):
    # fp32 statistics; matches torch.nn.LayerNorm defaults (eps=1e-5).
    mu = jnp.mean(x, axis=-1, keepdims=True)
    var = jnp.mean(jnp.square(x - mu), axis=-1, keepdims=True)
    return (x - mu) * jax.lax.rsqrt(var + eps) * gamma + beta


def _gelu(x, approximate):
    if approximate:
        # tanh approximation -> EUP (separate bundle slot, effectively free).
        # Deviates ~1e-3 from torch.nn.GELU()'s exact-erf default.
        return 0.5 * x * (1.0 + jnp.tanh(0.7978845608028654 * (x + 0.044715 * x * x * x)))
    # erf formulation == torch.nn.GELU() default; kept in fp32.
    return 0.5 * x * (1.0 + jax.lax.erf(x * _INV_SQRT2))


def mlp_kernel(x_ref, w0_ref, b0_ref, wh_ref, bh_ref, lng_ref, lnb_ref,
               gf_ref, bf_ref, wout_ref, bout_ref, out_ref, *, approx_gelu):
    # First Linear with the concat already fused: one 2E-deep bf16 MXU matmul
    # accumulating in fp32.
    x = jnp.dot(x_ref[...], w0_ref[...], preferred_element_type=jnp.float32)
    x = x + b0_ref[...]                        # b0 [1, F] broadcasts over batch tile
    resid = x

    num_layers = wh_ref.shape[0]               # static Python int (small, unrolled)
    for l in range(num_layers):
        h = _layer_norm(x, lng_ref[l:l + 1, :], lnb_ref[l:l + 1, :])
        h = jnp.dot(h.astype(jnp.bfloat16), wh_ref[l],
                    preferred_element_type=jnp.float32)
        h = h + bh_ref[l:l + 1, :]
        # nn.Dropout is identity in eval mode.
        # TODO(synk): training-mode dropout (pltpu.prng_* stochastic mask) not implemented.
        h = _gelu(h, approx_gelu)
        x = resid + h
        resid = x

    h = _layer_norm(x, gf_ref[...], bf_ref[...])
    y = jnp.dot(h.astype(jnp.bfloat16), wout_ref[...],
                preferred_element_type=jnp.float32)
    out_ref[...] = y + bout_ref[...]           # [TB, 128]; padded cols are exact zeros


# ----------------------------------------------------------------------------
# Parameter construction / one-time kernel-side weight prep.
# ----------------------------------------------------------------------------

def init_params(key, vocab_size, embed_dim, ffn_dim, num_layers):
    ks = jax.random.split(key, 6)
    two_e = 2 * embed_dim
    return {
        "emb":  jax.random.normal(ks[0], (vocab_size, embed_dim), jnp.float32),
        "w0":   jax.random.normal(ks[1], (two_e, ffn_dim), jnp.float32) / jnp.sqrt(float(two_e)),
        "b0":   jnp.zeros((1, ffn_dim), jnp.float32),
        "wh":   jax.random.normal(ks[2], (num_layers, ffn_dim, ffn_dim), jnp.float32) / jnp.sqrt(float(ffn_dim)),
        "bh":   0.01 * jax.random.normal(ks[3], (num_layers, ffn_dim), jnp.float32),
        "ln_g": jnp.ones((num_layers, ffn_dim), jnp.float32),
        "ln_b": jnp.zeros((num_layers, ffn_dim), jnp.float32),
        "gf":   jnp.ones((1, ffn_dim), jnp.float32),
        "bf":   jnp.zeros((1, ffn_dim), jnp.float32),
        "wout": jax.random.normal(ks[4], (ffn_dim, 3), jnp.float32) / jnp.sqrt(float(ffn_dim)),
        "bout": 0.01 * jax.random.normal(ks[5], (1, 3), jnp.float32),
    }


def prepare_params(params):
    """One-time weight prep (bf16 casts + lane-dense 128-padded head).

    Hoisted out of the per-call jit so the forward pass does no per-call
    convert/pad glue kernels.
    """
    ffn_dim = params["w0"].shape[1]
    wout_pad = jnp.zeros((ffn_dim, _OUT_PAD), jnp.bfloat16).at[:, :3].set(
        params["wout"].astype(jnp.bfloat16))
    bout_pad = jnp.zeros((1, _OUT_PAD), jnp.float32).at[:, :3].set(params["bout"])
    return {
        "emb":  params["emb"].astype(jnp.bfloat16),
        "w0":   params["w0"].astype(jnp.bfloat16),     # single [2E, F] weight
        "b0":   params["b0"],
        "wh":   params["wh"].astype(jnp.bfloat16),
        "bh":   params["bh"],
        "ln_g": params["ln_g"],
        "ln_b": params["ln_b"],
        "gf":   params["gf"],
        "bf":   params["bf"],
        "wout_pad": wout_pad,
        "bout_pad": bout_pad,
    }


# ----------------------------------------------------------------------------
# Forward pass.
# ----------------------------------------------------------------------------

def _choose_tile(batch):
    # Big, bf16-sublane-aligned (16-row) tiles: weights are resident so per-step
    # VMEM is small and large tiles amortize the ~0.35 us per-grid-step overhead.
    tb = min(512, _round_up(batch, 16))
    bp = _round_up(batch, tb)
    # Prefer >= 2 grid steps so the "parallel" batch axis can be split across
    # v7x's two TensorCores (no-op for tiny demo batches).
    if bp // tb < 2 and batch > 16:
        tb = min(512, _round_up((batch + 1) // 2, 16))
        bp = _round_up(batch, tb)
    return tb, bp


def _device_vmem_cap_bytes():
    try:
        cap = getattr(pltpu.get_tpu_info(), "vmem_capacity_bytes", None)
        if cap:
            return int(cap)
    except Exception:
        pass
    return 64 << 20   # conservative default: v7x per-TensorCore VMEM


def _resident_spec(arr, single_buffer):
    # Full array, same block every grid step (block index never changes).
    nd = arr.ndim
    idx_map = lambda i, _nd=nd: (0,) * _nd
    if single_buffer and hasattr(pl, "Buffered"):
        try:
            # Single-buffer: default pipelining would double-buffer every input
            # for no benefit on a never-changing block (matters most on v7x).
            return pl.BlockSpec(arr.shape, idx_map, pipeline_mode=pl.Buffered(1))
        except TypeError:
            pass
    return pl.BlockSpec(arr.shape, idx_map)


@partial(jax.jit, static_argnames=("approx_gelu", "single_buffer_weights"))
def mlp_forward(pert, gene, params, *, approx_gelu=False, single_buffer_weights=True):
    emb = params["emb"]                      # bf16 [V, E]
    embed_dim = emb.shape[1]
    two_e = 2 * embed_dim
    ffn_dim = params["w0"].shape[1]
    num_layers = params["wh"].shape[0]

    # Embedding lookup + concat fused into one [B, 2E] bf16 operand (glue JAX).
    x = jnp.concatenate([jnp.take(emb, pert, axis=0),
                         jnp.take(emb, gene, axis=0)], axis=1)
    batch = x.shape[0]

    tb, bp = _choose_tile(batch)
    if bp != batch:
        x = jnp.pad(x, ((0, bp - batch), (0, 0)))

    weight_args = (params["w0"], params["b0"], params["wh"], params["bh"],
                   params["ln_g"], params["ln_b"], params["gf"], params["bf"],
                   params["wout_pad"], params["bout_pad"])

    def row_spec(shape):
        return pl.BlockSpec(shape, lambda i: (i, 0))

    in_specs = [row_spec((tb, two_e))] + [
        # TODO(synk): for very large ffn_dim the resident-weight set can outgrow
        # v7x's 64 MiB VMEM; fall back to tiling layers/K via an extra
        # "arbitrary" grid axis or a nested pltpu.emit_pipeline over wh[l].
        _resident_spec(a, single_buffer_weights) for a in weight_args
    ]

    # VMEM budget: resident weights (assume worst-case double buffering),
    # double-buffered activation/output tiles, fp32 intermediates, slack —
    # clamped to ~80% of the device's physical VMEM (legal on v7x's 64 MiB).
    weight_bytes = int(sum(a.size * a.dtype.itemsize for a in weight_args))
    act_bytes = 2 * tb * two_e * 2 + 2 * tb * _OUT_PAD * 4
    scratch_bytes = 8 * tb * ffn_dim * 4
    vmem_need = 2 * weight_bytes + act_bytes + scratch_bytes + (8 << 20)
    vmem_limit = int(min(max(vmem_need, 16 << 20),
                         int(0.8 * _device_vmem_cap_bytes())))

    # Advisory cost estimate: count only the real 3-wide head, and only rsqrt
    # (plus tanh if the approximate GELU is enabled) as transcendentals.
    flops = 2 * bp * (two_e * ffn_dim + num_layers * ffn_dim * ffn_dim + ffn_dim * 3)
    transcendentals = bp * (num_layers + 1)
    if approx_gelu:
        transcendentals += bp * ffn_dim * num_layers
    bytes_accessed = int(x.size * x.dtype.itemsize + weight_bytes + bp * _OUT_PAD * 4)

    out = pl.pallas_call(
        partial(mlp_kernel, approx_gelu=approx_gelu),
        out_shape=jax.ShapeDtypeStruct((bp, _OUT_PAD), jnp.float32),
        grid=(bp // tb,),
        in_specs=in_specs,
        out_specs=row_spec((tb, _OUT_PAD)),
        compiler_params=pltpu.CompilerParams(
            dimension_semantics=("parallel",),      # 2 TCs on v7x; no-op on v5e/v6e
            vmem_limit_bytes=vmem_limit),
        cost_estimate=pl.CostEstimate(
            flops=flops,
            transcendentals=transcendentals,
            bytes_accessed=bytes_accessed),
    )(x, *weight_args)

    # torch .squeeze(1) is a no-op for a [B, 3] result; drop padded rows/lanes.
    return out[:batch, :3]


def mlp_reference(pert, gene, params):
    """Plain-JAX fp32 reference matching the PyTorch module (eval mode)."""
    emb = params["emb"]
    x = jnp.concatenate([emb[pert], emb[gene]], axis=1)
    x = x @ params["w0"] + params["b0"]
    resid = x
    for l in range(params["wh"].shape[0]):
        h = _layer_norm(x, params["ln_g"][l:l + 1], params["ln_b"][l:l + 1])
        h = h @ params["wh"][l] + params["bh"][l:l + 1]
        h = 0.5 * h * (1.0 + jax.lax.erf(h * _INV_SQRT2))
        x = resid + h
        resid = x
    h = _layer_norm(x, params["gf"], params["bf"])
    return h @ params["wout"] + params["bout"]


if __name__ == "__main__":
    # args: vocab_size=32, embed_dim=64, ffn_embed_dim=128, num_layers=2, dropout=0.1 (eval)
    VOCAB, EMBED, FFN, NLAYERS, B = 32, 64, 128, 2, 8

    key = jax.random.PRNGKey(0)
    kp, kg, kw = jax.random.split(key, 3)
    params = init_params(kw, VOCAB, EMBED, FFN, NLAYERS)
    prepped = prepare_params(params)        # one-time weight prep, outside the jit
    jax.block_until_ready(prepped)

    pert = jax.random.randint(kp, (B,), 0, VOCAB, dtype=jnp.int32)
    gene = jax.random.randint(kg, (B,), 0, VOCAB, dtype=jnp.int32)

    try:
        out = jax.block_until_ready(mlp_forward(pert, gene, prepped))
    except Exception:
        # Fallback if this jax build rejects single-buffered resident specs.
        out = jax.block_until_ready(
            mlp_forward(pert, gene, prepped, single_buffer_weights=False))

    assert out.shape == (B, 3) and out.dtype == jnp.float32
    assert bool(jnp.all(jnp.isfinite(out)))

    # bf16 MXU operands => ~1e-2-level deviation from the fp32 reference.
    ref = mlp_reference(pert, gene, params)
    max_err = float(jnp.max(jnp.abs(out - ref)))
    assert max_err < 0.25, f"max abs err vs fp32 reference: {max_err}"

    print("KERNEL_OK")
</pallas_src>

<mosaic_0001>
module attributes {stable_mosaic.version = 11 : i64} {
  func.func @mlp_kernel(%arg0: i32, %arg1: memref<16x128xbf16, #tpu.memory_space<vmem>>, %arg2: memref<128x128xbf16, #tpu.memory_space<vmem>>, %arg3: memref<1x128xf32, #tpu.memory_space<vmem>>, %arg4: memref<2x128x128xbf16, #tpu.memory_space<vmem>>, %arg5: memref<2x128xf32, #tpu.memory_space<vmem>>, %arg6: memref<2x128xf32, #tpu.memory_space<vmem>>, %arg7: memref<2x128xf32, #tpu.memory_space<vmem>>, %arg8: memref<1x128xf32, #tpu.memory_space<vmem>>, %arg9: memref<1x128xf32, #tpu.memory_space<vmem>>, %arg10: memref<128x128xbf16, #tpu.memory_space<vmem>>, %arg11: memref<1x128xf32, #tpu.memory_space<vmem>>, %arg12: memref<16x128xf32, #tpu.memory_space<vmem>>) attributes {dimension_semantics = [#tpu.dimension_semantics<parallel>], iteration_bounds = array<i64: 1>, scalar_prefetch = 0 : i64, scratch_operands = 0 : i64, tpu.core_type = #tpu.core_type<tc>, window_params = [{transform_indices = @transform_0, window_bounds = array<i64: 16, 128>}, {pipeline_mode = #tpu.pipeline_mode<synchronous>, transform_indices = @transform_1, window_bounds = array<i64: 128, 128>}, {pipeline_mode = #tpu.pipeline_mode<synchronous>, transform_indices = @transform_2, window_bounds = array<i64: 1, 128>}, {pipeline_mode = #tpu.pipeline_mode<synchronous>, transform_indices = @transform_3, window_bounds = array<i64: 2, 128, 128>}, {pipeline_mode = #tpu.pipeline_mode<synchronous>, transform_indices = @transform_4, window_bounds = array<i64: 2, 128>}, {pipeline_mode = #tpu.pipeline_mode<synchronous>, transform_indices = @transform_5, window_bounds = array<i64: 2, 128>}, {pipeline_mode = #tpu.pipeline_mode<synchronous>, transform_indices = @transform_6, window_bounds = array<i64: 2, 128>}, {pipeline_mode = #tpu.pipeline_mode<synchronous>, transform_indices = @transform_7, window_bounds = array<i64: 1, 128>}, {pipeline_mode = #tpu.pipeline_mode<synchronous>, transform_indices = @transform_8, window_bounds = array<i64: 1, 128>}, {pipeline_mode = #tpu.pipeline_mode<synchronous>, transform_indices = @transform_9, window_bounds = array<i64: 128, 128>}, {pipeline_mode = #tpu.pipeline_mode<synchronous>, transform_indices = @transform_10, window_bounds = array<i64: 1, 128>}, {transform_indices = @transform_11, window_bounds = array<i64: 16, 128>}]} {
    %c0 = arith.constant 0 : index
    %c0_0 = arith.constant 0 : index
    %0 = vector.load %arg1[%c0, %c0_0] : memref<16x128xbf16, #tpu.memory_space<vmem>>, vector<16x128xbf16>
    %c0_1 = arith.constant 0 : index
    %c0_2 = arith.constant 0 : index
    %1 = vector.load %arg2[%c0_1, %c0_2] : memref<128x128xbf16, #tpu.memory_space<vmem>>, vector<128x128xbf16>
    %cst = arith.constant dense<0.000000e+00> : vector<16x128xf32>
    %2 = tpu.matmul %0, %1, %cst {dimension_numbers = #tpu.dot_dimension_numbers<[1], [0], [0], [1], [0, 0, 1, 1], [], []>} : vector<16x128xbf16>, vector<128x128xbf16>, vector<16x128xf32> -> vector<16x128xf32>
    %c0_3 = arith.constant 0 : index
    %c0_4 = arith.constant 0 : index
    %3 = vector.load %arg3[%c0_3, %c0_4] : memref<1x128xf32, #tpu.memory_space<vmem>>, vector<1x128xf32>
    %4 = vector.broadcast %3 : vector<1x128xf32> to vector<16x128xf32>
    %5 = arith.addf %2, %4 : vector<16x128xf32>
    %c0_5 = arith.constant 0 : index
    %c0_6 = arith.constant 0 : index
    %6 = vector.load %arg6[%c0_5, %c0_6] : memref<2x128xf32, #tpu.memory_space<vmem>>, vector<1x128xf32>
    %c0_7 = arith.constant 0 : index
    %c0_8 = arith.constant 0 : index
    %7 = vector.load %arg7[%c0_7, %c0_8] : memref<2x128xf32, #tpu.memory_space<vmem>>, vector<1x128xf32>
    %cst_9 = arith.constant dense<0.000000e+00> : vector<16xf32>
    %8 = vector.multi_reduction <add>, %5, %cst_9 [1] : vector<16x128xf32> to vector<16xf32>
    %9 = vector.shape_cast %8 : vector<16xf32> to vector<16x1xf32>
    %cst_10 = arith.constant 1.280000e+02 : f32
    %10 = vector.broadcast %cst_10 : f32 to vector<16x1xf32>
    %11 = arith.divf %9, %10 : vector<16x1xf32>
    %12 = vector.broadcast %11 : vector<16x1xf32> to vector<16x128xf32>
    %13 = arith.subf %5, %12 : vector<16x128xf32>
    %14 = arith.mulf %13, %13 : vector<16x128xf32>
    %cst_11 = arith.constant dense<0.000000e+00> : vector<16xf32>
    %15 = vector.multi_reduction <add>, %14, %cst_11 [1] : vector<16x128xf32> to vector<16xf32>
    %16 = vector.shape_cast %15 : vector<16xf32> to vector<16x1xf32>
    %cst_12 = arith.constant 1.280000e+02 : f32
    %17 = vector.broadcast %cst_12 : f32 to vector<16x1xf32>
    %18 = arith.divf %16, %17 : vector<16x1xf32>
    %19 = vector.broadcast %11 : vector<16x1xf32> to vector<16x128xf32>
    %20 = arith.subf %5, %19 : vector<16x128xf32>
    %cst_13 = arith.constant 9.99999974E-6 : f32
    %21 = vector.broadcast %cst_13 : f32 to vector<16x1xf32>
    %22 = arith.addf %18, %21 : vector<16x1xf32>
    %23 = math.rsqrt %22 : vector<16x1xf32>
    %24 = vector.broadcast %23 : vector<16x1xf32> to vector<16x128xf32>
    %25 = arith.mulf %20, %24 : vector<16x128xf32>
    %26 = vector.broadcast %6 : vector<1x128xf32> to vector<16x128xf32>
    %27 = arith.mulf %25, %26 : vector<16x128xf32>
    %28 = vector.broadcast %7 : vector<1x128xf32> to vector<16x128xf32>
    %29 = arith.addf %27, %28 : vector<16x128xf32>
    %30 = arith.truncf %29 : vector<16x128xf32> to vector<16x128xbf16>
    %c0_14 = arith.constant 0 : index
    %c0_15 = arith.constant 0 : index
    %c0_16 = arith.constant 0 : index
    %31 = vector.load %arg4[%c0_14, %c0_15, %c0_16] : memref<2x128x128xbf16, #tpu.memory_space<vmem>>, vector<1x128x128xbf16>
    %32 = vector.shape_cast %31 : vector<1x128x128xbf16> to vector<128x128xbf16>
    %cst_17 = arith.constant dense<0.000000e+00> : vector<16x128xf32>
    %33 = tpu.matmul %30, %32, %cst_17 {dimension_numbers = #tpu.dot_dimension_numbers<[1], [0], [0], [1], [0, 0, 1, 1], [], []>} : vector<16x128xbf16>, vector<128x128xbf16>, vector<16x128xf32> -> vector<16x128xf32>
    %c0_18 = arith.constant 0 : index
    %c0_19 = arith.constant 0 : index
    %34 = vector.load %arg5[%c0_18, %c0_19] : memref<2x128xf32, #tpu.memory_space<vmem>>, vector<1x128xf32>
    %35 = vector.broadcast %34 : vector<1x128xf32> to vector<16x128xf32>
    %36 = arith.addf %33, %35 : vector<16x128xf32>
    %cst_20 = arith.constant 5.000000e-01 : f32
    %37 = vector.broadcast %cst_20 : f32 to vector<16x128xf32>
    %38 = arith.mulf %37, %36 : vector<16x128xf32>
    %cst_21 = arith.constant 0.707106769 : f32
    %39 = vector.broadcast %cst_21 : f32 to vector<16x128xf32>
    %40 = arith.mulf %36, %39 : vector<16x128xf32>
    %41 = math.erf %40 : vector<16x128xf32>
    %cst_22 = arith.constant 1.000000e+00 : f32
    %42 = vector.broadcast %cst_22 : f32 to vector<16x128xf32>
    %43 = arith.addf %42, %41 : vector<16x128xf32>
    %44 = arith.mulf %38, %43 : vector<16x128xf32>
    %45 = arith.addf %5, %44 : vector<16x128xf32>
    %c1 = arith.constant 1 : index
    %c0_23 = arith.constant 0 : index
    %46 = vector.load %arg6[%c1, %c0_23] : memref<2x128xf32, #tpu.memory_space<vmem>>, vector<1x128xf32>
    %c1_24 = arith.constant 1 : index
    %c0_25 = arith.constant 0 : index
    %47 = vector.load %arg7[%c1_24, %c0_25] : memref<2x128xf32, #tpu.memory_space<vmem>>, vector<1x128xf32>
    %cst_26 = arith.constant dense<0.000000e+00> : vector<16xf32>
    %48 = vector.multi_reduction <add>, %45, %cst_26 [1] : vector<16x128xf32> to vector<16xf32>
    %49 = vector.shape_cast %48 : vector<16xf32> to vector<16x1xf32>
    %cst_27 = arith.constant 1.280000e+02 : f32
    %50 = vector.broadcast %cst_27 : f32 to vector<16x1xf32>
    %51 = arith.divf %49, %50 : vector<16x1xf32>
    %52 = vector.broadcast %51 : vector<16x1xf32> to vector<16x128xf32>
    %53 = arith.subf %45, %52 : vector<16x128xf32>
    %54 = arith.mulf %53, %53 : vector<16x128xf32>
    %cst_28 = arith.constant dense<0.000000e+00> : vector<16xf32>
    %55 = vector.multi_reduction <add>, %54, %cst_28 [1] : vector<16x128xf32> to vector<16xf32>
    %56 = vector.shape_cast %55 : vector<16xf32> to vector<16x1xf32>
    %cst_29 = arith.constant 1.280000e+02 : f32
    %57 = vector.broadcast %cst_29 : f32 to vector<16x1xf32>
    %58 = arith.divf %56, %57 : vector<16x1xf32>
    %59 = vector.broadcast %51 : vector<16x1xf32> to vector<16x128xf32>
    %60 = arith.subf %45, %59 : vector<16x128xf32>
    %cst_30 = arith.constant 9.99999974E-6 : f32
    %61 = vector.broadcast %cst_30 : f32 to vector<16x1xf32>
    %62 = arith.addf %58, %61 : vector<16x1xf32>
    %63 = math.rsqrt %62 : vector<16x1xf32>
    %64 = vector.broadcast %63 : vector<16x1xf32> to vector<16x128xf32>
    %65 = arith.mulf %60, %64 : vector<16x128xf32>
    %66 = vector.broadcast %46 : vector<1x128xf32> to vector<16x128xf32>
    %67 = arith.mulf %65, %66 : vector<16x128xf32>
    %68 = vector.broadcast %47 : vector<1x128xf32> to vector<16x128xf32>
    %69 = arith.addf %67, %68 : vector<16x128xf32>
    %70 = arith.truncf %69 : vector<16x128xf32> to vector<16x128xbf16>
    %c1_31 = arith.constant 1 : index
    %c0_32 = arith.constant 0 : index
    %c0_33 = arith.constant 0 : index
    %71 = vector.load %arg4[%c1_31, %c0_32, %c0_33] : memref<2x128x128xbf16, #tpu.memory_space<vmem>>, vector<1x128x128xbf16>
    %72 = vector.shape_cast %71 : vector<1x128x128xbf16> to vector<128x128xbf16>
    %cst_34 = arith.constant dense<0.000000e+00> : vector<16x128xf32>
    %73 = tpu.matmul %70, %72, %cst_34 {dimension_numbers = #tpu.dot_dimension_numbers<[1], [0], [0], [1], [0, 0, 1, 1], [], []>} : vector<16x128xbf16>, vector<128x128xbf16>, vector<16x128xf32> -> vector<16x128xf32>
    %c1_35 = arith.constant 1 : index
    %c0_36 = arith.constant 0 : index
    %74 = vector.load %arg5[%c1_35, %c0_36] : memref<2x128xf32, #tpu.memory_space<vmem>>, vector<1x128xf32>
    %75 = vector.broadcast %74 : vector<1x128xf32> to vector<16x128xf32>
    %76 = arith.addf %73, %75 : vector<16x128xf32>
    %cst_37 = arith.constant 5.000000e-01 : f32
    %77 = vector.broadcast %cst_37 : f32 to vector<16x128xf32>
    %78 = arith.mulf %77, %76 : vector<16x128xf32>
    %cst_38 = arith.constant 0.707106769 : f32
    %79 = vector.broadcast %cst_38 : f32 to vector<16x128xf32>
    %80 = arith.mulf %76, %79 : vector<16x128xf32>
    %81 = math.erf %80 : vector<16x128xf32>
    %cst_39 = arith.constant 1.000000e+00 : f32
    %82 = vector.broadcast %cst_39 : f32 to vector<16x128xf32>
    %83 = arith.addf %82, %81 : vector<16x128xf32>
    %84 = arith.mulf %78, %83 : vector<16x128xf32>
    %85 = arith.addf %45, %84 : vector<16x128xf32>
    %c0_40 = arith.constant 0 : index
    %c0_41 = arith.constant 0 : index
    %86 = vector.load %arg8[%c0_40, %c0_41] : memref<1x128xf32, #tpu.memory_space<vmem>>, vector<1x128xf32>
    %c0_42 = arith.constant 0 : index
    %c0_43 = arith.constant 0 : index
    %87 = vector.load %arg9[%c0_42, %c0_43] : memref<1x128xf32, #tpu.memory_space<vmem>>, vector<1x128xf32>
    %cst_44 = arith.constant dense<0.000000e+00> : vector<16xf32>
    %88 = vector.multi_reduction <add>, %85, %cst_44 [1] : vector<16x128xf32> to vector<16xf32>
    %89 = vector.shape_cast %88 : vector<16xf32> to vector<16x1xf32>
    %cst_45 = arith.constant 1.280000e+02 : f32
    %90 = vector.broadcast %cst_45 : f32 to vector<16x1xf32>
    %91 = arith.divf %89, %90 : vector<16x1xf32>
    %92 = vector.broadcast %91 : vector<16x1xf32> to vector<16x128xf32>
    %93 = arith.subf %85, %92 : vector<16x128xf32>
    %94 = arith.mulf %93, %93 : vector<16x128xf32>
    %cst_46 = arith.constant dense<0.000000e+00> : vector<16xf32>
    %95 = vector.multi_reduction <add>, %94, %cst_46 [1] : vector<16x128xf32> to vector<16xf32>
    %96 = vector.shape_cast %95 : vector<16xf32> to vector<16x1xf32>
    %cst_47 = arith.constant 1.280000e+02 : f32
    %97 = vector.broadcast %cst_47 : f32 to vector<16x1xf32>
    %98 = arith.divf %96, %97 : vector<16x1xf32>
    %99 = vector.broadcast %91 : vector<16x1xf32> to vector<16x128xf32>
    %100 = arith.subf %85, %99 : vector<16x128xf32>
    %cst_48 = arith.constant 9.99999974E-6 : f32
    %101 = vector.broadcast %cst_48 : f32 to vector<16x1xf32>
    %102 = arith.addf %98, %101 : vector<16x1xf32>
    %103 = math.rsqrt %102 : vector<16x1xf32>
    %104 = vector.broadcast %103 : vector<16x1xf32> to vector<16x128xf32>
    %105 = arith.mulf %100, %104 : vector<16x128xf32>
    %106 = vector.broadcast %86 : vector<1x128xf32> to vector<16x128xf32>
    %107 = arith.mulf %105, %106 : vector<16x128xf32>
    %108 = vector.broadcast %87 : vector<1x128xf32> to vector<16x128xf32>
    %109 = arith.addf %107, %108 : vector<16x128xf32>
    %110 = arith.truncf %109 : vector<16x128xf32> to vector<16x128xbf16>
    %c0_49 = arith.constant 0 : index
    %c0_50 = arith.constant 0 : index
    %111 = vector.load %arg10[%c0_49, %c0_50] : memref<128x128xbf16, #tpu.memory_space<vmem>>, vector<128x128xbf16>
    %cst_51 = arith.constant dense<0.000000e+00> : vector<16x128xf32>
    %112 = tpu.matmul %110, %111, %cst_51 {dimension_numbers = #tpu.dot_dimension_numbers<[1], [0], [0], [1], [0, 0, 1, 1], [], []>} : vector<16x128xbf16>, vector<128x128xbf16>, vector<16x128xf32> -> vector<16x128xf32>
    %c0_52 = arith.constant 0 : index
    %c0_53 = arith.constant 0 : index
    %113 = vector.load %arg11[%c0_52, %c0_53] : memref<1x128xf32, #tpu.memory_space<vmem>>, vector<1x128xf32>
    %114 = vector.broadcast %113 : vector<1x128xf32> to vector<16x128xf32>
    %115 = arith.addf %112, %114 : vector<16x128xf32>
    %c0_54 = arith.constant 0 : index
    %c0_55 = arith.constant 0 : index
    %116 = vector.load %arg12[%c0_54, %c0_55] : memref<16x128xf32, #tpu.memory_space<vmem>>, vector<16x128xf32>
    tpu.vector_store %arg12[%c0_54, %c0_55], %115 {strides = array<i32>} : memref<16x128xf32, #tpu.memory_space<vmem>>, vector<16x128xf32>,
    return
  }
  func.func @transform_0(%arg0: i32) -> (i32, i32) {
    %c0_i32 = arith.constant 0 : i32
    %c0_i32_0 = arith.constant 0 : i32
    return %arg0, %c0_i32 : i32, i32
  }
  func.func @transform_1(%arg0: i32) -> (i32, i32) {
    %c0_i32 = arith.constant 0 : i32
    %c0_i32_0 = arith.constant 0 : i32
    %c0_i32_1 = arith.constant 0 : i32
    return %c0_i32, %c0_i32_0 : i32, i32
  }
  func.func @transform_2(%arg0: i32) -> (i32, i32) {
    %c0_i32 = arith.constant 0 : i32
    %c0_i32_0 = arith.constant 0 : i32
    %c0_i32_1 = arith.constant 0 : i32
    return %c0_i32, %c0_i32_0 : i32, i32
  }
  func.func @transform_3(%arg0: i32) -> (i32, i32, i32) {
    %c0_i32 = arith.constant 0 : i32
    %c0_i32_0 = arith.constant 0 : i32
    %c0_i32_1 = arith.constant 0 : i32
    %c0_i32_2 = arith.constant 0 : i32
    return %c0_i32, %c0_i32_0, %c0_i32_1 : i32, i32, i32
  }
  func.func @transform_4(%arg0: i32) -> (i32, i32) {
    %c0_i32 = arith.constant 0 : i32
    %c0_i32_0 = arith.constant 0 : i32
    %c0_i32_1 = arith.constant 0 : i32
    return %c0_i32, %c0_i32_0 : i32, i32
  }
  func.func @transform_5(%arg0: i32) -> (i32, i32) {
    %c0_i32 = arith.constant 0 : i32
    %c0_i32_0 = arith.constant 0 : i32
    %c0_i32_1 = arith.constant 0 : i32
    return %c0_i32, %c0_i32_0 : i32, i32
  }
  func.func @transform_6(%arg0: i32) -> (i32, i32) {
    %c0_i32 = arith.constant 0 : i32
    %c0_i32_0 = arith.constant 0 : i32
    %c0_i32_1 = arith.constant 0 : i32
    return %c0_i32, %c0_i32_0 : i32, i32
  }
  func.func @transform_7(%arg0: i32) -> (i32, i32) {
    %c0_i32 = arith.constant 0 : i32
    %c0_i32_0 = arith.constant 0 : i32
    %c0_i32_1 = arith.constant 0 : i32
    return %c0_i32, %c0_i32_0 : i32, i32
  }
  func.func @transform_8(%arg0: i32) -> (i32, i32) {
    %c0_i32 = arith.constant 0 : i32
    %c0_i32_0 = arith.constant 0 : i32
    %c0_i32_1 = arith.constant 0 : i32
    return %c0_i32, %c0_i32_0 : i32, i32
  }
  func.func @transform_9(%arg0: i32) -> (i32, i32) {
    %c0_i32 = arith.constant 0 : i32
    %c0_i32_0 = arith.constant 0 : i32
    %c0_i32_1 = arith.constant 0 : i32
    return %c0_i32, %c0_i32_0 : i32, i32
  }
  func.func @transform_10(%arg0: i32) -> (i32, i32) {
    %c0_i32 = arith.constant 0 : i32
    %c0_i32_0 = arith.constant 0 : i32
    %c0_i32_1 = arith.constant 0 : i32
    return %c0_i32, %c0_i32_0 : i32, i32
  }
  func.func @transform_11(%arg0: i32) -> (i32, i32) {
    %c0_i32 = arith.constant 0 : i32
    %c0_i32_0 = arith.constant 0 : i32
    return %arg0, %c0_i32 : i32, i32
  }
}

module attributes {stable_mosaic.version = 11 : i64} {
  func.func @mlp_kernel(%arg0: i32, %arg1: memref<16x128xbf16, #tpu.memory_space<vmem>>, %arg2: memref<128x128xbf16, #tpu.memory_space<vmem>>, %arg3: memref<1x128xf32, #tpu.memory_space<vmem>>, %arg4: memref<2x128x128xbf16, #tpu.memory_space<vmem>>, %arg5: memref<2x128xf32, #tpu.memory_space<vmem>>, %arg6: memref<2x128xf32, #tpu.memory_space<vmem>>, %arg7: memref<2x128xf32, #tpu.memory_space<vmem>>, %arg8: memref<1x128xf32, #tpu.memory_space<vmem>>, %arg9: memref<1x128xf32, #tpu.memory_space<vmem>>, %arg10: memref<128x128xbf16, #tpu.memory_space<vmem>>, %arg11: memref<1x128xf32, #tpu.memory_space<vmem>>, %arg12: memref<16x128xf32, #tpu.memory_space<vmem>>) attributes {dimension_semantics = [#tpu.dimension_semantics<parallel>], iteration_bounds = array<i64: 1>, scalar_prefetch = 0 : i64, scratch_operands = 0 : i64, tpu.core_type = #tpu.core_type<tc>, window_params = [{transform_indices = @transform_0, window_bounds = array<i64: 16, 128>}, {pipeline_mode = #tpu.pipeline_mode<synchronous>, transform_indices = @transform_1, window_bounds = array<i64: 128, 128>}, {pipeline_mode = #tpu.pipeline_mode<synchronous>, transform_indices = @transform_2, window_bounds = array<i64: 1, 128>}, {pipeline_mode = #tpu.pipeline_mode<synchronous>, transform_indices = @transform_3, window_bounds = array<i64: 2, 128, 128>}, {pipeline_mode = #tpu.pipeline_mode<synchronous>, transform_indices = @transform_4, window_bounds = array<i64: 2, 128>}, {pipeline_mode = #tpu.pipeline_mode<synchronous>, transform_indices = @transform_5, window_bounds = array<i64: 2, 128>}, {pipeline_mode = #tpu.pipeline_mode<synchronous>, transform_indices = @transform_6, window_bounds = array<i64: 2, 128>}, {pipeline_mode = #tpu.pipeline_mode<synchronous>, transform_indices = @transform_7, window_bounds = array<i64: 1, 128>}, {pipeline_mode = #tpu.pipeline_mode<synchronous>, transform_indices = @transform_8, window_bounds = array<i64: 1, 128>}, {pipeline_mode = #tpu.pipeline_mode<synchronous>, transform_indices = @transform_9, window_bounds = array<i64: 128, 128>}, {pipeline_mode = #tpu.pipeline_mode<synchronous>, transform_indices = @transform_10, window_bounds = array<i64: 1, 128>}, {transform_indices = @transform_11, window_bounds = array<i64: 16, 128>}]} {
    %c0 = arith.constant 0 : index
    %c0_0 = arith.constant 0 : index
    %0 = vector.load %arg1[%c0, %c0_0] : memref<16x128xbf16, #tpu.memory_space<vmem>>, vector<16x128xbf16>
    %c0_1 = arith.constant 0 : index
    %c0_2 = arith.constant 0 : index
    %1 = vector.load %arg2[%c0_1, %c0_2] : memref<128x128xbf16, #tpu.memory_space<vmem>>, vector<128x128xbf16>
    %cst = arith.constant dense<0.000000e+00> : vector<16x128xf32>
    %2 = tpu.matmul %0, %1, %cst {dimension_numbers = #tpu.dot_dimension_numbers<[1], [0], [0], [1], [0, 0, 1, 1], [], []>} : vector<16x128xbf16>, vector<128x128xbf16>, vector<16x128xf32> -> vector<16x128xf32>
    %c0_3 = arith.constant 0 : index
    %c0_4 = arith.constant 0 : index
    %3 = vector.load %arg3[%c0_3, %c0_4] : memref<1x128xf32, #tpu.memory_space<vmem>>, vector<1x128xf32>
    %4 = vector.broadcast %3 : vector<1x128xf32> to vector<16x128xf32>
    %5 = arith.addf %2, %4 : vector<16x128xf32>
    %c0_5 = arith.constant 0 : index
    %c0_6 = arith.constant 0 : index
    %6 = vector.load %arg6[%c0_5, %c0_6] : memref<2x128xf32, #tpu.memory_space<vmem>>, vector<1x128xf32>
    %c0_7 = arith.constant 0 : index
    %c0_8 = arith.constant 0 : index
    %7 = vector.load %arg7[%c0_7, %c0_8] : memref<2x128xf32, #tpu.memory_space<vmem>>, vector<1x128xf32>
    %cst_9 = arith.constant dense<0.000000e+00> : vector<16xf32>
    %8 = vector.multi_reduction <add>, %5, %cst_9 [1] : vector<16x128xf32> to vector<16xf32>
    %9 = vector.shape_cast %8 : vector<16xf32> to vector<16x1xf32>
    %cst_10 = arith.constant 1.280000e+02 : f32
    %10 = vector.broadcast %cst_10 : f32 to vector<16x1xf32>
    %11 = arith.divf %9, %10 : vector<16x1xf32>
    %12 = vector.broadcast %11 : vector<16x1xf32> to vector<16x128xf32>
    %13 = arith.subf %5, %12 : vector<16x128xf32>
    %14 = arith.mulf %13, %13 : vector<16x128xf32>
    %cst_11 = arith.constant dense<0.000000e+00> : vector<16xf32>
    %15 = vector.multi_reduction <add>, %14, %cst_11 [1] : vector<16x128xf32> to vector<16xf32>
    %16 = vector.shape_cast %15 : vector<16xf32> to vector<16x1xf32>
    %cst_12 = arith.constant 1.280000e+02 : f32
    %17 = vector.broadcast %cst_12 : f32 to vector<16x1xf32>
    %18 = arith.divf %16, %17 : vector<16x1xf32>
    %19 = vector.broadcast %11 : vector<16x1xf32> to vector<16x128xf32>
    %20 = arith.subf %5, %19 : vector<16x128xf32>
    %cst_13 = arith.constant 9.99999974E-6 : f32
    %21 = vector.broadcast %cst_13 : f32 to vector<16x1xf32>
    %22 = arith.addf %18, %21 : vector<16x1xf32>
    %23 = math.rsqrt %22 : vector<16x1xf32>
    %24 = vector.broadcast %23 : vector<16x1xf32> to vector<16x128xf32>
    %25 = arith.mulf %20, %24 : vector<16x128xf32>
    %26 = vector.broadcast %6 : vector<1x128xf32> to vector<16x128xf32>
    %27 = arith.mulf %25, %26 : vector<16x128xf32>
    %28 = vector.broadcast %7 : vector<1x128xf32> to vector<16x128xf32>
    %29 = arith.addf %27, %28 : vector<16x128xf32>
    %30 = arith.truncf %29 : vector<16x128xf32> to vector<16x128xbf16>
    %c0_14 = arith.constant 0 : index
    %c0_15 = arith.constant 0 : index
    %c0_16 = arith.constant 0 : index
    %31 = vector.load %arg4[%c0_14, %c0_15, %c0_16] : memref<2x128x128xbf16, #tpu.memory_space<vmem>>, vector<1x128x128xbf16>
    %32 = vector.shape_cast %31 : vector<1x128x128xbf16> to vector<128x128xbf16>
    %cst_17 = arith.constant dense<0.000000e+00> : vector<16x128xf32>
    %33 = tpu.matmul %30, %32, %cst_17 {dimension_numbers = #tpu.dot_dimension_numbers<[1], [0], [0], [1], [0, 0, 1, 1], [], []>} : vector<16x128xbf16>, vector<128x128xbf16>, vector<16x128xf32> -> vector<16x128xf32>
    %c0_18 = arith.constant 0 : index
    %c0_19 = arith.constant 0 : index
    %34 = vector.load %arg5[%c0_18, %c0_19] : memref<2x128xf32, #tpu.memory_space<vmem>>, vector<1x128xf32>
    %35 = vector.broadcast %34 : vector<1x128xf32> to vector<16x128xf32>
    %36 = arith.addf %33, %35 : vector<16x128xf32>
    %cst_20 = arith.constant 5.000000e-01 : f32
    %37 = vector.broadcast %cst_20 : f32 to vector<16x128xf32>
    %38 = arith.mulf %37, %36 : vector<16x128xf32>
    %cst_21 = arith.constant 0.707106769 : f32
    %39 = vector.broadcast %cst_21 : f32 to vector<16x128xf32>
    %40 = arith.mulf %36, %39 : vector<16x128xf32>
    %41 = math.erf %40 : vector<16x128xf32>
    %cst_22 = arith.constant 1.000000e+00 : f32
    %42 = vector.broadcast %cst_22 : f32 to vector<16x128xf32>
    %43 = arith.addf %42, %41 : vector<16x128xf32>
    %44 = arith.mulf %38, %43 : vector<16x128xf32>
    %45 = arith.addf %5, %44 : vector<16x128xf32>
    %c1 = arith.constant 1 : index
    %c0_23 = arith.constant 0 : index
    %46 = vector.load %arg6[%c1, %c0_23] : memref<2x128xf32, #tpu.memory_space<vmem>>, vector<1x128xf32>
    %c1_24 = arith.constant 1 : index
    %c0_25 = arith.constant 0 : index
    %47 = vector.load %arg7[%c1_24, %c0_25] : memref<2x128xf32, #tpu.memory_space<vmem>>, vector<1x128xf32>
    %cst_26 = arith.constant dense<0.000000e+00> : vector<16xf32>
    %48 = vector.multi_reduction <add>, %45, %cst_26 [1] : vector<16x128xf32> to vector<16xf32>
    %49 = vector.shape_cast %48 : vector<16xf32> to vector<16x1xf32>
    %cst_27 = arith.constant 1.280000e+02 : f32
    %50 = vector.broadcast %cst_27 : f32 to vector<16x1xf32>
    %51 = arith.divf %49, %50 : vector<16x1xf32>
    %52 = vector.broadcast %51 : vector<16x1xf32> to vector<16x128xf32>
    %53 = arith.subf %45, %52 : vector<16x128xf32>
    %54 = arith.mulf %53, %53 : vector<16x128xf32>
    %cst_28 = arith.constant dense<0.000000e+00> : vector<16xf32>
    %55 = vector.multi_reduction <add>, %54, %cst_28 [1] : vector<16x128xf32> to vector<16xf32>
    %56 = vector.shape_cast %55 : vector<16xf32> to vector<16x1xf32>
    %cst_29 = arith.constant 1.280000e+02 : f32
    %57 = vector.broadcast %cst_29 : f32 to vector<16x1xf32>
    %58 = arith.divf %56, %57 : vector<16x1xf32>
    %59 = vector.broadcast %51 : vector<16x1xf32> to vector<16x128xf32>
    %60 = arith.subf %45, %59 : vector<16x128xf32>
    %cst_30 = arith.constant 9.99999974E-6 : f32
    %61 = vector.broadcast %cst_30 : f32 to vector<16x1xf32>
    %62 = arith.addf %58, %61 : vector<16x1xf32>
    %63 = math.rsqrt %62 : vector<16x1xf32>
    %64 = vector.broadcast %63 : vector<16x1xf32> to vector<16x128xf32>
    %65 = arith.mulf %60, %64 : vector<16x128xf32>
    %66 = vector.broadcast %46 : vector<1x128xf32> to vector<16x128xf32>
    %67 = arith.mulf %65, %66 : vector<16x128xf32>
    %68 = vector.broadcast %47 : vector<1x128xf32> to vector<16x128xf32>
    %69 = arith.addf %67, %68 : vector<16x128xf32>
    %70 = arith.truncf %69 : vector<16x128xf32> to vector<16x128xbf16>
    %c1_31 = arith.constant 1 : index
    %c0_32 = arith.constant 0 : index
    %c0_33 = arith.constant 0 : index
    %71 = vector.load %arg4[%c1_31, %c0_32, %c0_33] : memref<2x128x128xbf16, #tpu.memory_space<vmem>>, vector<1x128x128xbf16>
    %72 = vector.shape_cast %71 : vector<1x128x128xbf16> to vector<128x128xbf16>
    %cst_34 = arith.constant dense<0.000000e+00> : vector<16x128xf32>
    %73 = tpu.matmul %70, %72, %cst_34 {dimension_numbers = #tpu.dot_dimension_numbers<[1], [0], [0], [1], [0, 0, 1, 1], [], []>} : vector<16x128xbf16>, vector<128x128xbf16>, vector<16x128xf32> -> vector<16x128xf32>
    %c1_35 = arith.constant 1 : index
    %c0_36 = arith.constant 0 : index
    %74 = vector.load %arg5[%c1_35, %c0_36] : memref<2x128xf32, #tpu.memory_space<vmem>>, vector<1x128xf32>
    %75 = vector.broadcast %74 : vector<1x128xf32> to vector<16x128xf32>
    %76 = arith.addf %73, %75 : vector<16x128xf32>
    %cst_37 = arith.constant 5.000000e-01 : f32
    %77 = vector.broadcast %cst_37 : f32 to vector<16x128xf32>
    %78 = arith.mulf %77, %76 : vector<16x128xf32>
    %cst_38 = arith.constant 0.707106769 : f32
    %79 = vector.broadcast %cst_38 : f32 to vector<16x128xf32>
    %80 = arith.mulf %76, %79 : vector<16x128xf32>
    %81 = math.erf %80 : vector<16x128xf32>
    %cst_39 = arith.constant 1.000000e+00 : f32
    %82 = vector.broadcast %cst_39 : f32 to vector<16x128xf32>
    %83 = arith.addf %82, %81 : vector<16x128xf32>
    %84 = arith.mulf %78, %83 : vector<16x128xf32>
    %85 = arith.addf %45, %84 : vector<16x128xf32>
    %c0_40 = arith.constant 0 : index
    %c0_41 = arith.constant 0 : index
    %86 = vector.load %arg8[%c0_40, %c0_41] : memref<1x128xf32, #tpu.memory_space<vmem>>, vector<1x128xf32>
    %c0_42 = arith.constant 0 : index
    %c0_43 = arith.constant 0 : index
    %87 = vector.load %arg9[%c0_42, %c0_43] : memref<1x128xf32, #tpu.memory_space<vmem>>, vector<1x128xf32>
    %cst_44 = arith.constant dense<0.000000e+00> : vector<16xf32>
    %88 = vector.multi_reduction <add>, %85, %cst_44 [1] : vector<16x128xf32> to vector<16xf32>
    %89 = vector.shape_cast %88 : vector<16xf32> to vector<16x1xf32>
    %cst_45 = arith.constant 1.280000e+02 : f32
    %90 = vector.broadcast %cst_45 : f32 to vector<16x1xf32>
    %91 = arith.divf %89, %90 : vector<16x1xf32>
    %92 = vector.broadcast %91 : vector<16x1xf32> to vector<16x128xf32>
    %93 = arith.subf %85, %92 : vector<16x128xf32>
    %94 = arith.mulf %93, %93 : vector<16x128xf32>
    %cst_46 = arith.constant dense<0.000000e+00> : vector<16xf32>
    %95 = vector.multi_reduction <add>, %94, %cst_46 [1] : vector<16x128xf32> to vector<16xf32>
    %96 = vector.shape_cast %95 : vector<16xf32> to vector<16x1xf32>
    %cst_47 = arith.constant 1.280000e+02 : f32
    %97 = vector.broadcast %cst_47 : f32 to vector<16x1xf32>
    %98 = arith.divf %96, %97 : vector<16x1xf32>
    %99 = vector.broadcast %91 : vector<16x1xf32> to vector<16x128xf32>
    %100 = arith.subf %85, %99 : vector<16x128xf32>
    %cst_48 = arith.constant 9.99999974E-6 : f32
    %101 = vector.broadcast %cst_48 : f32 to vector<16x1xf32>
    %102 = arith.addf %98, %101 : vector<16x1xf32>
    %103 = math.rsqrt %102 : vector<16x1xf32>
    %104 = vector.broadcast %103 : vector<16x1xf32> to vector<16x128xf32>
    %105 = arith.mulf %100, %104 : vector<16x128xf32>
    %106 = vector.broadcast %86 : vector<1x128xf32> to vector<16x128xf32>
    %107 = arith.mulf %105, %106 : vector<16x128xf32>
    %108 = vector.broadcast %87 : vector<1x128xf32> to vector<16x128xf32>
    %109 = arith.addf %107, %108 : vector<16x128xf32>
    %110 = arith.truncf %109 : vector<16x128xf32> to vector<16x128xbf16>
    %c0_49 = arith.constant 0 : index
    %c0_50 = arith.constant 0 : index
    %111 = vector.load %arg10[%c0_49, %c0_50] : memref<128x128xbf16, #tpu.memory_space<vmem>>, vector<128x128xbf16>
    %cst_51 = arith.constant dense<0.000000e+00> : vector<16x128xf32>
    %112 = tpu.matmul %110, %111, %cst_51 {dimension_numbers = #tpu.dot_dimension_numbers<[1], [0], [0], [1], [0, 0, 1, 1], [], []>} : vector<16x128xbf16>, vector<128x128xbf16>, vector<16x128xf32> -> vector<16x128xf32>
    %c0_52 = arith.constant 0 : index
    %c0_53 = arith.constant 0 : index
    %113 = vector.load %arg11[%c0_52, %c0_53] : memref<1x128xf32, #tpu.memory_space<vmem>>, vector<1x128xf32>
    %114 = vector.broadcast %113 : vector<1x128xf32> to vector<16x128xf32>
    %115 = arith.addf %112, %114 : vector<16x128xf32>
    %c0_54 = arith.constant 0 : index
    %c0_55 = arith.constant 0 : index
    %116 = vector.load %arg12[%c0_54, %c0_55] : memref<16x128xf32, #tpu.memory_space<vmem>>, vector<16x128xf32>
    tpu.vector_store %arg12[%c0_54, %c0_55], %115 {strides = array<i32>} : memref<16x128xf32, #tpu.memory_space<vmem>>, vector<16x128xf32>,
    return
  }
  func.func @transform_0(%arg0: i32) -> (i32, i32) {
    %c0_i32 = arith.constant 0 : i32
    %c0_i32_0 = arith.constant 0 : i32
    return %arg0, %c0_i32 : i32, i32
  }
  func.func @transform_1(%arg0: i32) -> (i32, i32) {
    %c0_i32 = arith.constant 0 : i32
    %c0_i32_0 = arith.constant 0 : i32
    %c0_i32_1 = arith.constant 0 : i32
    return %c0_i32, %c0_i32_0 : i32, i32
  }
  func.func @transform_2(%arg0: i32) -> (i32, i32) {
    %c0_i32 = arith.constant 0 : i32
    %c0_i32_0 = arith.constant 0 : i32
    %c0_i32_1 = arith.constant 0 : i32
    return %c0_i32, %c0_i32_0 : i32, i32
  }
  func.func @transform_3(%arg0: i32) -> (i32, i32, i32) {
    %c0_i32 = arith.constant 0 : i32
    %c0_i32_0 = arith.constant 0 : i32
    %c0_i32_1 = arith.constant 0 : i32
    %c0_i32_2 = arith.constant 0 : i32
    return %c0_i32, %c0_i32_0, %c0_i32_1 : i32, i32, i32
  }
  func.func @transform_4(%arg0: i32) -> (i32, i32) {
    %c0_i32 = arith.constant 0 : i32
    %c0_i32_0 = arith.constant 0 : i32
    %c0_i32_1 = arith.constant 0 : i32
    return %c0_i32, %c0_i32_0 : i32, i32
  }
  func.func @transform_5(%arg0: i32) -> (i32, i32) {
    %c0_i32 = arith.constant 0 : i32
    %c0_i32_0 = arith.constant 0 : i32
    %c0_i32_1 = arith.constant 0 : i32
    return %c0_i32, %c0_i32_0 : i32, i32
  }
  func.func @transform_6(%arg0: i32) -> (i32, i32) {
    %c0_i32 = arith.constant 0 : i32
    %c0_i32_0 = arith.constant 0 : i32
    %c0_i32_1 = arith.constant 0 : i32
    return %c0_i32, %c0_i32_0 : i32, i32
  }
  func.func @transform_7(%arg0: i32) -> (i32, i32) {
    %c0_i32 = arith.constant 0 : i32
    %c0_i32_0 = arith.constant 0 : i32
    %c0_i32_1 = arith.constant 0 : i32
    return %c0_i32, %c0_i32_0 : i32, i32
  }
  func.func @transform_8(%arg0: i32) -> (i32, i32) {
    %c0_i32 = arith.constant 0 : i32
    %c0_i32_0 = arith.constant 0 : i32
    %c0_i32_1 = arith.constant 0 : i32
    return %c0_i32, %c0_i32_0 : i32, i32
  }
  func.func @transform_9(%arg0: i32) -> (i32, i32) {
    %c0_i32 = arith.constant 0 : i32
    %c0_i32_0 = arith.constant 0 : i32
    %c0_i32_1 = arith.constant 0 : i32
    return %c0_i32, %c0_i32_0 : i32, i32
  }
  func.func @transform_10(%arg0: i32) -> (i32, i32) {
    %c0_i32 = arith.constant 0 : i32
    %c0_i32_0 = arith.constant 0 : i32
    %c0_i32_1 = arith.constant 0 : i32
    return %c0_i32, %c0_i32_0 : i32, i32
  }
  func.func @transform_11(%arg0: i32) -> (i32, i32) {
    %c0_i32 = arith.constant 0 : i32
    %c0_i32_0 = arith.constant 0 : i32
    return %arg0, %c0_i32 : i32, i32
  }
}

</mosaic_0001>

<bundles_post_ra>
// kernel: mlp_forward.1
= control target key start
LH: loop header
LB: loop body
LE: loop exit
PB: predicated region body
PF: predicated region fallthrough
CT: control target
= control target key end

     0   :  { %16 = vsyncpa [#allocation3], 0  ;;  %s1165_s0 = inlined_call_operand.vmem [shape: bf16[16,128], index: 0, kind: input, shape index: {}]   ;;  %s1166_s1 = inlined_call_operand.hbm [shape: bf16[128,128], index: 1, kind: input, shape index: {}]   ;;  %s1167_s2 = inlined_call_operand.vmem [shape: f32[1,128], index: 2, kind: input, shape index: {}]   ;;  %s1168_s3 = inlined_call_operand.vmem [shape: bf16[2,128,128], index: 3, kind: input, shape index: {}]   ;;  %s1169_s4 = inlined_call_operand.vmem [shape: f32[2,128], index: 4, kind: input, shape index: {}]   ;;  %s1170_s5 = inlined_call_operand.vmem [shape: f32[2,128], index: 5, kind: input, shape index: {}]   ;;  %s1171_s6 = inlined_call_operand.vmem [shape: f32[2,128], index: 6, kind: input, shape index: {}]   ;;  %s1172_s7 = inlined_call_operand.vmem [shape: f32[1,128], index: 7, kind: input, shape index: {}]   ;;  %s1173_s8 = inlined_call_operand.vmem [shape: f32[1,128], index: 8, kind: input, shape index: {}]   ;;  %s1174_s9 = inlined_call_operand.hbm [shape: bf16[128,128], index: 9, kind: input, shape index: {}]   ;;  %s1175_s10 = inlined_call_operand.vmem [shape: f32[1,128], index: 10, kind: input, shape index: {}]   ;;  %s1176_s11 = inlined_call_operand.vmem [shape: f32[16,128], index: 11, kind: output, shape index: {}]  }
   0x1   :  { %17 = vsyncpa [#allocation5], 0  ;;  %s946_s17 = smov [#allocation2]  }
   0x2   :  { %s25_s18 = sshll.u32 %s946_s17, 4  ;;  %s26_s18 = int_to_ptr.vmem [resolvable:$true] %s25_s18 }
   0x3   :  { %s910_s19 = scalar_lea.vmem %s26_s18, 1024  ;;  %p915_p1 = scmp.lt.s32.totalorder %s26_s18, %s26_s18 }
   0x4   :  { %p911_p0 = scmp.ne.s32.totalorder %s26_s18, %s910_s19  ;;  %p916_p2 = scmp.lt.s32.totalorder %s910_s19, %s910_s19 }
   0x6   :  { %p917_p3 = por %p916_p2, %p915_p1 }
   0x8   :  { %p918_p4 = pnand %p917_p3, %p911_p0 }
   0xa   :  { %921 = shalt.err (!%p918_p4)
}
   0xb   :  { %s947_s20 = smov 64   ;;  %s948_s21 = smov 4  }
   0xc   :  { %31 = dma.hbm_to_vmem [thread:$0]  %s1166_s1, 1024, %s26_s18, [#allocation3], %s947_s20, %s947_s20, %s948_s21  }
   0xd   :  { %s949_s24 = smov [#allocation4]  }
   0xe   :  { %s51_s25 = sshll.u32 %s949_s24, 4  ;;  %s52_s25 = int_to_ptr.vmem [resolvable:$true] %s51_s25 }
   0xf   :  { %s930_s26 = scalar_lea.vmem %s52_s25, 1024  ;;  %p935_p6 = scmp.lt.s32.totalorder %s52_s25, %s52_s25 }
  0x10   :  { %p931_p5 = scmp.ne.s32.totalorder %s52_s25, %s930_s26  ;;  %p936_p7 = scmp.lt.s32.totalorder %s930_s26, %s930_s26 }
  0x12   :  { %p937_p8 = por %p936_p7, %p935_p6 }
  0x14   :  { %p938_p9 = pnand %p937_p8, %p931_p5 }
  0x16   :  { %941 = shalt.err (!%p938_p9)
}
  0x17   :  { %57 = dma.hbm_to_vmem [thread:$0]  %s1174_s9, 1024, %s52_s25, [#allocation5], %s947_s20, %s947_s20, %s948_s21  }
  0x18   :  { %942 = dma.done.wait [#allocation3], 1024  }
  0x19   :  { %943 = vsyncadd [#allocation3], 4294966272 }
  0x1a   :  { %944 = dma.done.wait [#allocation5], 1024  }
  0x1b   :  { %945 = vsyncadd [#allocation5], 4294966272  ;;  %v950_v0 = vmov 0.0   ;;  %vm951_vm0 = vmmov 0   ;;  %v849_v1 = vld [vmem:[#allocation2 + $0x38] sm:$0xff]   ;;  %v850_v2 = vld [vmem:[#allocation2 + $0x30] sm:$0xff]  }
  0x1c   :  { %763 = vmatprep.subr.bf16.mxu0 %v950_v0  ;;  %779 = vmatprep.mubr.msk.bf16.mxu0 %vm951_vm0, %v950_v0  ;;  %v851_v3 = vld [vmem:[#allocation2 + $0x28] sm:$0xff]   ;;  %v852_v4 = vld [vmem:[#allocation2 + $0x20] sm:$0xff]   ;;  %v853_v5 = vld [vmem:[#allocation2 + $0x18] sm:$0xff]  }
  0x1d   :  { %783 = vmatprep.subr.bf16.mxu1 %v950_v0  ;;  %799 = vmatprep.mubr.msk.bf16.mxu1 %vm951_vm0, %v950_v0  ;;  %v854_v6 = vld [vmem:[#allocation2 + $0x10] sm:$0xff]   ;;  %v855_v7 = vld [vmem:[#allocation2 + $0x8] sm:$0xff]   ;;  %v856_v8 = vld [vmem:[#allocation2] sm:$0xff]  }
  0x1e   :  { %764 = vmatpush3.bf16.msra.mxu0 %v849_v1  ;;  %v857_v9 = vld [vmem:[%s1165_s0] sm:$0xff]   ;;  %v858_v17 = vld [vmem:[%s1168_s3 + $0x38] sm:$0xff]   ;;  %v859_v26 = vld [vmem:[%s1168_s3 + $0x30] sm:$0xff]  }
  0x1f   :  { %765 = vmatprep.subr.bf16.mxu0 %v950_v0  ;;  %v668_v10 = vld [vmem:[%s1167_s2] ss:$0 sm:$0xff]  ;;  %784 = vmatpush3.bf16.msra.mxu1 %v858_v17  ;;  %v860_v27 = vld [vmem:[%s1168_s3 + $0x28] sm:$0xff]   ;;  %v862_v29 = vld [vmem:[%s1168_s3 + $0x18] sm:$0xff]  }
  0x20   :  { %785 = vmatprep.subr.bf16.mxu1 %v950_v0  ;;  %v861_v28 = vld [vmem:[%s1168_s3 + $0x20] sm:$0xff]   ;;  %v863_v30 = vld [vmem:[%s1168_s3 + $0x10] sm:$0xff]   ;;  %v864_v31 = vld [vmem:[%s1168_s3 + $0x8] sm:$0xff]  }
  0x21   :  { %v865_v32 = vld [vmem:[%s1168_s3] sm:$0xff]  }
  0x22   :  { %766 = vmatpush3.bf16.msra.mxu0 %v850_v2  ;;  %v678_v41 = vld [vmem:[%s1170_s5] ss:$0 sm:$0xff] }
  0x23   :  { %767 = vmatprep.subr.bf16.mxu0 %v950_v0  ;;  %786 = vmatpush3.bf16.msra.mxu1 %v859_v26  ;;  %v679_v45 = vld [vmem:[%s1171_s6] ss:$0 sm:$0xff] }
  0x24   :  { %787 = vmatprep.subr.bf16.mxu1 %v950_v0  ;;  %v680_v50 = vld [vmem:[%s1169_s4] ss:$0 sm:$0xff] }
  0x25   :  { %v869_v17 = vld [vmem:[%s1168_s3 + $0x60] sm:$0xff]  }
  0x26   :  { %768 = vmatpush3.bf16.msra.mxu0 %v851_v3 }
  0x27   :  { %769 = vmatprep.subr.bf16.mxu0 %v950_v0  ;;  %788 = vmatpush3.bf16.msra.mxu1 %v860_v27 }
  0x28   :  { %789 = vmatprep.subr.bf16.mxu1 %v950_v0 }
  0x2a   :  { %770 = vmatpush3.bf16.msra.mxu0 %v852_v4 }
  0x2b   :  { %771 = vmatprep.subr.bf16.mxu0 %v950_v0  ;;  %790 = vmatpush3.bf16.msra.mxu1 %v861_v28 }
  0x2c   :  { %791 = vmatprep.subr.bf16.mxu1 %v950_v0 }
  0x2e   :  { %772 = vmatpush3.bf16.msra.mxu0 %v853_v5 }
  0x2f   :  { %773 = vmatprep.subr.bf16.mxu0 %v950_v0  ;;  %792 = vmatpush3.bf16.msra.mxu1 %v862_v29 }
  0x30   :  { %793 = vmatprep.subr.bf16.mxu1 %v950_v0 }
  0x32   :  { %774 = vmatpush3.bf16.msra.mxu0 %v854_v6  ;;  %v866_v6 = vld [vmem:[%s1168_s3 + $0x78] sm:$0xff]  }
  0x33   :  { %775 = vmatprep.subr.bf16.mxu0 %v950_v0  ;;  %794 = vmatpush3.bf16.msra.mxu1 %v863_v30  ;;  %v689_v30 = vld [vmem:[%s1170_s5 + $0x1] ss:$0 sm:$0xff] }
  0x34   :  { %795 = vmatprep.subr.bf16.mxu1 %v950_v0 }
  0x36   :  { %776 = vmatpush3.bf16.msra.mxu0 %v855_v7 }
  0x37   :  { %777 = vmatprep.subr.bf16.mxu0 %v950_v0  ;;  %796 = vmatpush3.bf16.msra.mxu1 %v864_v31 }
  0x38   :  { %797 = vmatprep.subr.bf16.mxu1 %v950_v0 }
  0x3a   :  { %778 = vmatpush3.bf16.msra.mxu0 %v856_v8 }
  0x3b   :  { %803 = vmatprep.subr.bf16.mxu0 %v950_v0  ;;  %798 = vmatpush3.bf16.msra.mxu1 %v865_v32 }
  0x3c   :  { %823 = vmatprep.subr.bf16.mxu1 %v950_v0 }
  0x3d   :  { %780 = vmatmul.mubr.bf16.vlgmr.msra.gmra.mxu0 %v857_v9 }
  0x3e   :  { %819 = vmatprep.mubr.msk.bf16.mxu0 %vm951_vm0, %v950_v0  ;;  %804 = vmatpush3.bf16.msra.mxu0 %v866_v6  ;;  %v877_v6 = vld [vmem:[#allocation4 + $0x20] sm:$0xff]  }
  0x3f   :  { %805 = vmatprep.subr.bf16.mxu0 %v950_v0 }
  0xfd   :  { %v180_v11 = vpop.f32.mrf.mxu0 }
  0xfe   :  { %v1040_v12 = vadd.f32 %v668_v10, %v180_v11 }
  0xff   :  { %v781_v13 = vpop.f32.mrf.mxu0 }
 0x100   :  { %189 = vadd.xlane.f32.xlu0 %v1040_v12 }
 0x101   :  { %v183_v14 = vpop.f32.mrf.mxu0 }
 0x102   :  { %v1043_v15 = vadd.f32 %v668_v10, %v183_v14 }
 0x103   :  { %v782_v16 = vpop.f32.mrf.mxu0 }
 0x104   :  { %191 = vadd.xlane.f32.xlu0 %v1043_v15  ;;  %v868_v16 = vld [vmem:[%s1168_s3 + $0x68] sm:$0xff]  }
 0x189   :  { %v190_v18 = vpop.xlane.xlu0 %189 }
 0x18a   :  { %v194_v19 = vmul.f32 0.0078125, %v190_v18  ;;  %v870_v18 = vld [vmem:[%s1168_s3 + $0x58] sm:$0xff]  }
 0x18c   :  { %v196_v20 = vsub.f32 %v1040_v12, %v194_v19  ;;  %v871_v19 = vld [vmem:[%s1168_s3 + $0x50] sm:$0xff]  }
 0x18d   :  { %v192_v21 = vpop.xlane.xlu0 %191 }
 0x18e   :  { %v195_v22 = vmul.f32 0.0078125, %v192_v21  ;;  %v198_v23 = vmul.f32 %v196_v20, %v196_v20  ;;  %v873_v21 = vld [vmem:[%s1168_s3 + $0x40] sm:$0xff]  }
 0x190   :  { %v197_v24 = vsub.f32 %v1043_v15, %v195_v22  ;;  %200 = vadd.xlane.f32.xlu1 %v198_v23 }
 0x192   :  { %v199_v25 = vmul.f32 %v197_v24, %v197_v24 }
 0x194   :  { %202 = vadd.xlane.f32.xlu1 %v199_v25 }
 0x219   :  { %v201_v33 = vpop.xlane.xlu1 %200 }
 0x21a   :  { %v204_v34 = vmul.f32 0.0078125, %v201_v33 }
 0x21c   :  { %v206_v35 = vadd.f32 1e-05, %v204_v34  ;;  %v690_v34 = vld [vmem:[%s1171_s6 + $0x1] ss:$0 sm:$0xff] }
 0x21d   :  { %v203_v36 = vpop.xlane.xlu1 %202 }
 0x21e   :  { %882 = vrsqrt.f32 %v206_v35  ;;  %v205_v37 = vmul.f32 0.0078125, %v203_v36 }
 0x220   :  { %v207_v38 = vadd.f32 1e-05, %v205_v37 }
 0x222   :  { %884 = vrsqrt.f32 %v207_v38 }
 0x22b   :  { %v883_v39 = vpop.eup %882 }
 0x22c   :  { %v210_v40 = vmul.f32 %v883_v39, %v196_v20  ;;  %v872_v20 = vld [vmem:[%s1168_s3 + $0x48] sm:$0xff]   ;;  %v707_v39 = vld [vmem:[%s1169_s4 + $0x1] ss:$0 sm:$0xff] }
 0x22e   :  { %v216_v44 = vmul.f32 %v678_v41, %v210_v40 }
 0x22f   :  { %v885_v42 = vpop.eup %884 }
 0x230   :  { %v211_v43 = vmul.f32 %v885_v42, %v197_v24  ;;  %v222_v47 = vadd.f32 %v679_v45, %v216_v44 }
 0x232   :  { %v217_v46 = vmul.f32 %v678_v41, %v211_v43 }
 0x234   :  { %v223_v48 = vadd.f32 %v679_v45, %v217_v46 }
 0x236   :  { %v224_v49 = vpack.c.bf16 %v223_v48, %v222_v47 }
 0x238   :  { %800 = vmatmul.mubr.bf16.vlgmr.msra.gmra.mxu1 %v224_v49 }
 0x239   :  { %839 = vmatprep.mubr.msk.bf16.mxu1 %vm951_vm0, %v950_v0 }
 0x2f8   :  { %v328_v51 = vpop.f32.mrf.mxu1 }
 0x2f9   :  { %v329_v52 = vadd.f32 %v680_v50, %v328_v51 }
 0x2fa   :  { %v801_v53 = vpop.f32.mrf.mxu1 }
 0x2fb   :  { %v337_v54 = vmul.f32 0.70710677, %v329_v52  ;;  %v335_v60 = vmul.f32 0.5, %v329_v52 }
 0x2fc   :  { %v331_v55 = vpop.f32.mrf.mxu1 }
 0x2fd   :  { %886 = verf.f32 %v337_v54  ;;  %v332_v56 = vadd.f32 %v680_v50, %v331_v55 }
 0x2fe   :  { %v802_v57 = vpop.f32.mrf.mxu1 }
 0x2ff   :  { %v338_v58 = vmul.f32 0.70710677, %v332_v56  ;;  %v336_v1 = vmul.f32 0.5, %v332_v56 }
 0x301   :  { %888 = verf.f32 %v338_v58  ;;  %v874_v58 = vld [vmem:[#allocation4 + $0x38] sm:$0xff]  }
 0x302   :  { %824 = vmatpush3.bf16.msra.mxu1 %v874_v58 }
 0x303   :  { %825 = vmatprep.subr.bf16.mxu1 %v950_v0 }
 0x30a   :  { %v887_v59 = vpop.eup %886 }
 0x30b   :  { %v341_v61 = vadd.f32 1.0, %v887_v59 }
 0x30d   :  { %v343_v62 = vmul.f32 %v341_v61, %v335_v60 }
 0x30e   :  { %v889_v63 = vpop.eup %888 }
 0x30f   :  { %v342_v2 = vadd.f32 1.0, %v889_v63  ;;  %v1092_v3 = vadd.f32 %v343_v62, %v1040_v12 }
 0x311   :  { %v344_v4 = vmul.f32 %v342_v2, %v336_v1  ;;  %349 = vadd.xlane.f32.xlu0 %v1092_v3 }
 0x313   :  { %v1096_v5 = vadd.f32 %v344_v4, %v1043_v15  ;;  %v867_v15 = vld [vmem:[%s1168_s3 + $0x70] sm:$0xff]  }
 0x314   :  { %806 = vmatpush3.bf16.msra.mxu0 %v867_v15 }
 0x315   :  { %351 = vadd.xlane.f32.xlu1 %v1096_v5  ;;  %807 = vmatprep.subr.bf16.mxu0 %v950_v0 }
 0x318   :  { %808 = vmatpush3.bf16.msra.mxu0 %v868_v16 }
 0x319   :  { %809 = vmatprep.subr.bf16.mxu0 %v950_v0 }
 0x31c   :  { %810 = vmatpush3.bf16.msra.mxu0 %v869_v17 }
 0x31d   :  { %811 = vmatprep.subr.bf16.mxu0 %v950_v0 }
 0x320   :  { %812 = vmatpush3.bf16.msra.mxu0 %v870_v18 }
 0x321   :  { %813 = vmatprep.subr.bf16.mxu0 %v950_v0 }
 0x324   :  { %814 = vmatpush3.bf16.msra.mxu0 %v871_v19  ;;  %v716_v19 = vld [vmem:[%s1172_s7] ss:$0 sm:$0xff] }
 0x325   :  { %815 = vmatprep.subr.bf16.mxu0 %v950_v0 }
 0x328   :  { %816 = vmatpush3.bf16.msra.mxu0 %v872_v20 }
 0x329   :  { %817 = vmatprep.subr.bf16.mxu0 %v950_v0 }
 0x32c   :  { %818 = vmatpush3.bf16.msra.mxu0 %v873_v21 }
 0x39a   :  { %v350_v7 = vpop.xlane.xlu0 %349 }
 0x39b   :  { %v353_v8 = vmul.f32 0.0078125, %v350_v7  ;;  %v878_v7 = vld [vmem:[#allocation4 + $0x18] sm:$0xff]  }
 0x39d   :  { %v355_v9 = vsub.f32 %v1092_v3, %v353_v8  ;;  %v879_v8 = vld [vmem:[#allocation4 + $0x10] sm:$0xff]  }
 0x39e   :  { %v352_v10 = vpop.xlane.xlu1 %351 }
 0x39f   :  { %v354_v11 = vmul.f32 0.0078125, %v352_v10  ;;  %v357_v12 = vmul.f32 %v355_v9, %v355_v9  ;;  %v881_v10 = vld [vmem:[#allocation4] sm:$0xff]  }
 0x3a1   :  { %v356_v13 = vsub.f32 %v1096_v5, %v354_v11  ;;  %359 = vadd.xlane.f32.xlu0 %v357_v12 }
 0x3a3   :  { %v358_v14 = vmul.f32 %v356_v13, %v356_v13 }
 0x3a5   :  { %361 = vadd.xlane.f32.xlu1 %v358_v14 }
 0x42a   :  { %v360_v22 = vpop.xlane.xlu0 %359 }
 0x42b   :  { %v363_v23 = vmul.f32 0.0078125, %v360_v22 }
 0x42d   :  { %v365_v24 = vadd.f32 1e-05, %v363_v23 }
 0x42e   :  { %v362_v25 = vpop.xlane.xlu1 %361 }
 0x42f   :  { %890 = vrsqrt.f32 %v365_v24  ;;  %v364_v26 = vmul.f32 0.0078125, %v362_v25 }
 0x431   :  { %v366_v27 = vadd.f32 1e-05, %v364_v26 }
 0x433   :  { %892 = vrsqrt.f32 %v366_v27  ;;  %v718_v27 = vld [vmem:[%s1175_s10] ss:$0 sm:$0xff] }
 0x43c   :  { %v891_v28 = vpop.eup %890 }
 0x43d   :  { %v369_v29 = vmul.f32 %v891_v28, %v355_v9  ;;  %v880_v9 = vld [vmem:[#allocation4 + $0x8] sm:$0xff]  }
 0x43f   :  { %v375_v33 = vmul.f32 %v689_v30, %v369_v29 }
 0x440   :  { %v893_v31 = vpop.eup %892 }
 0x441   :  { %v370_v32 = vmul.f32 %v893_v31, %v356_v13  ;;  %v381_v36 = vadd.f32 %v690_v34, %v375_v33 }
 0x443   :  { %v376_v35 = vmul.f32 %v689_v30, %v370_v32 }
 0x445   :  { %v382_v37 = vadd.f32 %v690_v34, %v376_v35 }
 0x447   :  { %v383_v38 = vpack.c.bf16 %v382_v37, %v381_v36 }
 0x449   :  { %820 = vmatmul.mubr.bf16.vlgmr.msra.gmra.mxu0 %v383_v38 }
 0x509   :  { %v488_v40 = vpop.f32.mrf.mxu0 }
 0x50a   :  { %v489_v41 = vadd.f32 %v707_v39, %v488_v40 }
 0x50b   :  { %v821_v42 = vpop.f32.mrf.mxu0 }
 0x50c   :  { %v497_v43 = vmul.f32 0.70710677, %v489_v41  ;;  %v495_v49 = vmul.f32 0.5, %v489_v41 }
 0x50d   :  { %v491_v44 = vpop.f32.mrf.mxu0 }
 0x50e   :  { %894 = verf.f32 %v497_v43  ;;  %v492_v45 = vadd.f32 %v707_v39, %v491_v44 }
 0x50f   :  { %v822_v46 = vpop.f32.mrf.mxu0 }
 0x510   :  { %v498_v47 = vmul.f32 0.70710677, %v492_v45  ;;  %v496_v53 = vmul.f32 0.5, %v492_v45 }
 0x512   :  { %896 = verf.f32 %v498_v47 }
 0x51b   :  { %v895_v48 = vpop.eup %894 }
 0x51c   :  { %v501_v50 = vadd.f32 1.0, %v895_v48 }
 0x51e   :  { %v503_v51 = vmul.f32 %v501_v50, %v495_v49 }
 0x51f   :  { %v897_v52 = vpop.eup %896 }
 0x520   :  { %v505_v54 = vadd.f32 %v503_v51, %v1092_v3  ;;  %v502_v55 = vadd.f32 1.0, %v897_v52  ;;  %v875_v3 = vld [vmem:[#allocation4 + $0x30] sm:$0xff]  }
 0x521   :  { %826 = vmatpush3.bf16.msra.mxu1 %v875_v3 }
 0x522   :  { %509 = vadd.xlane.f32.xlu0 %v505_v54  ;;  %v504_v56 = vmul.f32 %v502_v55, %v496_v53  ;;  %827 = vmatprep.subr.bf16.mxu1 %v950_v0 }
 0x524   :  { %v506_v57 = vadd.f32 %v504_v56, %v1096_v5  ;;  %v876_v5 = vld [vmem:[#allocation4 + $0x28] sm:$0xff]  }
 0x525   :  { %828 = vmatpush3.bf16.msra.mxu1 %v876_v5 }
 0x526   :  { %511 = vadd.xlane.f32.xlu1 %v506_v57  ;;  %829 = vmatprep.subr.bf16.mxu1 %v950_v0 }
 0x529   :  { %830 = vmatpush3.bf16.msra.mxu1 %v877_v6 }
 0x52a   :  { %831 = vmatprep.subr.bf16.mxu1 %v950_v0 }
 0x52d   :  { %832 = vmatpush3.bf16.msra.mxu1 %v878_v7 }
 0x52e   :  { %833 = vmatprep.subr.bf16.mxu1 %v950_v0 }
 0x531   :  { %834 = vmatpush3.bf16.msra.mxu1 %v879_v8 }
 0x532   :  { %835 = vmatprep.subr.bf16.mxu1 %v950_v0 }
 0x535   :  { %836 = vmatpush3.bf16.msra.mxu1 %v880_v9 }
 0x536   :  { %837 = vmatprep.subr.bf16.mxu1 %v950_v0  ;;  %v717_v0 = vld [vmem:[%s1173_s8] ss:$0 sm:$0xff] }
 0x539   :  { %838 = vmatpush3.bf16.msra.mxu1 %v881_v10 }
 0x5ab   :  { %v510_v59 = vpop.xlane.xlu0 %509 }
 0x5ac   :  { %v513_v60 = vmul.f32 0.0078125, %v510_v59 }
 0x5ae   :  { %v515_v61 = vsub.f32 %v505_v54, %v513_v60 }
 0x5af   :  { %v512_v62 = vpop.xlane.xlu1 %511 }
 0x5b0   :  { %v514_v63 = vmul.f32 0.0078125, %v512_v62  ;;  %v517_v1 = vmul.f32 %v515_v61, %v515_v61 }
 0x5b2   :  { %v516_v2 = vsub.f32 %v506_v57, %v514_v63  ;;  %519 = vadd.xlane.f32.xlu0 %v517_v1 }
 0x5b4   :  { %v518_v4 = vmul.f32 %v516_v2, %v516_v2 }
 0x5b6   :  { %521 = vadd.xlane.f32.xlu1 %v518_v4 }
 0x63b   :  { %v520_v11 = vpop.xlane.xlu0 %519 }
 0x63c   :  { %v523_v12 = vmul.f32 0.0078125, %v520_v11 }
 0x63e   :  { %v525_v13 = vadd.f32 1e-05, %v523_v12 }
 0x63f   :  { %v522_v14 = vpop.xlane.xlu1 %521 }
 0x640   :  { %898 = vrsqrt.f32 %v525_v13  ;;  %v524_v15 = vmul.f32 0.0078125, %v522_v14 }
 0x642   :  { %v526_v16 = vadd.f32 1e-05, %v524_v15 }
 0x644   :  { %900 = vrsqrt.f32 %v526_v16 }
 0x64d   :  { %v899_v17 = vpop.eup %898 }
 0x64e   :  { %v529_v18 = vmul.f32 %v899_v17, %v515_v61 }
 0x650   :  { %v537_v22 = vmul.f32 %v716_v19, %v529_v18 }
 0x651   :  { %v901_v20 = vpop.eup %900 }
 0x652   :  { %v530_v21 = vmul.f32 %v901_v20, %v516_v2  ;;  %v545_v24 = vadd.f32 %v717_v0, %v537_v22 }
 0x654   :  { %v538_v23 = vmul.f32 %v716_v19, %v530_v21 }
 0x656   :  { %v546_v25 = vadd.f32 %v717_v0, %v538_v23 }
 0x658   :  { %v547_v26 = vpack.c.bf16 %v546_v25, %v545_v24 }
 0x65a   :  { %840 = vmatmul.mubr.bf16.vlgmr.msra.gmra.mxu1 %v547_v26 }
 0x71a   :  { %v653_v28 = vpop.f32.mrf.mxu1 }
 0x71b   :  { %v654_v29 = vadd.f32 %v718_v27, %v653_v28 }
 0x71c   :  { %v841_v30 = vpop.f32.mrf.mxu1 }
 0x71d   :  { %660 = vst [vmem:[%s1176_s11] sm:$0xff] %v654_v29 }
 0x71e   :  { %v656_v31 = vpop.f32.mrf.mxu1 }
 0x71f   :  { %v657_v32 = vadd.f32 %v718_v27, %v656_v31 }
 0x720   :  { %v842_v33 = vpop.f32.mrf.mxu1 }
 0x721   :  { %661 = vst [vmem:[%s1176_s11 + $0x8] sm:$0xff] %v657_v32 }
 0x722   :  { %666 = vsyncpa [#allocation3], 1 }
 0x723   :  { %667 = vsyncpa [#allocation5], 1 }

// kernel: mlp_forward.1
= control target key start
LH: loop header
LB: loop body
LE: loop exit
PB: predicated region body
PF: predicated region fallthrough
CT: control target
= control target key end

     0   :  { %16 = vsyncpa [#allocation3], 0  ;;  %s1165_s0 = inlined_call_operand.vmem [shape: bf16[16,128], index: 0, kind: input, shape index: {}]   ;;  %s1166_s1 = inlined_call_operand.hbm [shape: bf16[128,128], index: 1, kind: input, shape index: {}]   ;;  %s1167_s2 = inlined_call_operand.vmem [shape: f32[1,128], index: 2, kind: input, shape index: {}]   ;;  %s1168_s3 = inlined_call_operand.vmem [shape: bf16[2,128,128], index: 3, kind: input, shape index: {}]   ;;  %s1169_s4 = inlined_call_operand.vmem [shape: f32[2,128], index: 4, kind: input, shape index: {}]   ;;  %s1170_s5 = inlined_call_operand.vmem [shape: f32[2,128], index: 5, kind: input, shape index: {}]   ;;  %s1171_s6 = inlined_call_operand.vmem [shape: f32[2,128], index: 6, kind: input, shape index: {}]   ;;  %s1172_s7 = inlined_call_operand.vmem [shape: f32[1,128], index: 7, kind: input, shape index: {}]   ;;  %s1173_s8 = inlined_call_operand.vmem [shape: f32[1,128], index: 8, kind: input, shape index: {}]   ;;  %s1174_s9 = inlined_call_operand.hbm [shape: bf16[128,128], index: 9, kind: input, shape index: {}]   ;;  %s1175_s10 = inlined_call_operand.vmem [shape: f32[1,128], index: 10, kind: input, shape index: {}]   ;;  %s1176_s11 = inlined_call_operand.vmem [shape: f32[16,128], index: 11, kind: output, shape index: {}]  }
   0x1   :  { %17 = vsyncpa [#allocation5], 0  ;;  %s946_s17 = smov [#allocation2]  }
   0x2   :  { %s25_s18 = sshll.u32 %s946_s17, 4  ;;  %s26_s18 = int_to_ptr.vmem [resolvable:$true] %s25_s18 }
   0x3   :  { %s910_s19 = scalar_lea.vmem %s26_s18, 1024  ;;  %p915_p1 = scmp.lt.s32.totalorder %s26_s18, %s26_s18 }
   0x4   :  { %p911_p0 = scmp.ne.s32.totalorder %s26_s18, %s910_s19  ;;  %p916_p2 = scmp.lt.s32.totalorder %s910_s19, %s910_s19 }
   0x6   :  { %p917_p3 = por %p916_p2, %p915_p1 }
   0x8   :  { %p918_p4 = pnand %p917_p3, %p911_p0 }
   0xa   :  { %921 = shalt.err (!%p918_p4)
}
   0xb   :  { %s947_s20 = smov 64   ;;  %s948_s21 = smov 4  }
   0xc   :  { %31 = dma.hbm_to_vmem [thread:$0]  %s1166_s1, 1024, %s26_s18, [#allocation3], %s947_s20, %s947_s20, %s948_s21  }
   0xd   :  { %s949_s24 = smov [#allocation4]  }
   0xe   :  { %s51_s25 = sshll.u32 %s949_s24, 4  ;;  %s52_s25 = int_to_ptr.vmem [resolvable:$true] %s51_s25 }
   0xf   :  { %s930_s26 = scalar_lea.vmem %s52_s25, 1024  ;;  %p935_p6 = scmp.lt.s32.totalorder %s52_s25, %s52_s25 }
  0x10   :  { %p931_p5 = scmp.ne.s32.totalorder %s52_s25, %s930_s26  ;;  %p936_p7 = scmp.lt.s32.totalorder %s930_s26, %s930_s26 }
  0x12   :  { %p937_p8 = por %p936_p7, %p935_p6 }
  0x14   :  { %p938_p9 = pnand %p937_p8, %p931_p5 }
  0x16   :  { %941 = shalt.err (!%p938_p9)
}
  0x17   :  { %57 = dma.hbm_to_vmem [thread:$0]  %s1174_s9, 1024, %s52_s25, [#allocation5], %s947_s20, %s947_s20, %s948_s21  }
  0x18   :  { %942 = dma.done.wait [#allocation3], 1024  }
  0x19   :  { %943 = vsyncadd [#allocation3], 4294966272 }
  0x1a   :  { %944 = dma.done.wait [#allocation5], 1024  }
  0x1b   :  { %945 = vsyncadd [#allocation5], 4294966272  ;;  %v950_v0 = vmov 0.0   ;;  %vm951_vm0 = vmmov 0   ;;  %v849_v1 = vld [vmem:[#allocation2 + $0x38] sm:$0xff]   ;;  %v850_v2 = vld [vmem:[#allocation2 + $0x30] sm:$0xff]  }
  0x1c   :  { %763 = vmatprep.subr.bf16.mxu0 %v950_v0  ;;  %779 = vmatprep.mubr.msk.bf16.mxu0 %vm951_vm0, %v950_v0  ;;  %v851_v3 = vld [vmem:[#allocation2 + $0x28] sm:$0xff]   ;;  %v852_v4 = vld [vmem:[#allocation2 + $0x20] sm:$0xff]   ;;  %v853_v5 = vld [vmem:[#allocation2 + $0x18] sm:$0xff]  }
  0x1d   :  { %783 = vmatprep.subr.bf16.mxu1 %v950_v0  ;;  %799 = vmatprep.mubr.msk.bf16.mxu1 %vm951_vm0, %v950_v0  ;;  %v854_v6 = vld [vmem:[#allocation2 + $0x10] sm:$0xff]   ;;  %v855_v7 = vld [vmem:[#allocation2 + $0x8] sm:$0xff]   ;;  %v856_v8 = vld [vmem:[#allocation2] sm:$0xff]  }
  0x1e   :  { %764 = vmatpush3.bf16.msra.mxu0 %v849_v1  ;;  %v857_v9 = vld [vmem:[%s1165_s0] sm:$0xff]   ;;  %v858_v17 = vld [vmem:[%s1168_s3 + $0x38] sm:$0xff]   ;;  %v859_v26 = vld [vmem:[%s1168_s3 + $0x30] sm:$0xff]  }
  0x1f   :  { %765 = vmatprep.subr.bf16.mxu0 %v950_v0  ;;  %v668_v10 = vld [vmem:[%s1167_s2] ss:$0 sm:$0xff]  ;;  %784 = vmatpush3.bf16.msra.mxu1 %v858_v17  ;;  %v860_v27 = vld [vmem:[%s1168_s3 + $0x28] sm:$0xff]   ;;  %v862_v29 = vld [vmem:[%s1168_s3 + $0x18] sm:$0xff]  }
  0x20   :  { %785 = vmatprep.subr.bf16.mxu1 %v950_v0  ;;  %v861_v28 = vld [vmem:[%s1168_s3 + $0x20] sm:$0xff]   ;;  %v863_v30 = vld [vmem:[%s1168_s3 + $0x10] sm:$0xff]   ;;  %v864_v31 = vld [vmem:[%s1168_s3 + $0x8] sm:$0xff]  }
  0x21   :  { %v865_v32 = vld [vmem:[%s1168_s3] sm:$0xff]  }
  0x22   :  { %766 = vmatpush3.bf16.msra.mxu0 %v850_v2  ;;  %v678_v41 = vld [vmem:[%s1170_s5] ss:$0 sm:$0xff] }
  0x23   :  { %767 = vmatprep.subr.bf16.mxu0 %v950_v0  ;;  %786 = vmatpush3.bf16.msra.mxu1 %v859_v26  ;;  %v679_v45 = vld [vmem:[%s1171_s6] ss:$0 sm:$0xff] }
  0x24   :  { %787 = vmatprep.subr.bf16.mxu1 %v950_v0  ;;  %v680_v50 = vld [vmem:[%s1169_s4] ss:$0 sm:$0xff] }
  0x25   :  { %v869_v17 = vld [vmem:[%s1168_s3 + $0x60] sm:$0xff]  }
  0x26   :  { %768 = vmatpush3.bf16.msra.mxu0 %v851_v3 }
  0x27   :  { %769 = vmatprep.subr.bf16.mxu0 %v950_v0  ;;  %788 = vmatpush3.bf16.msra.mxu1 %v860_v27 }
  0x28   :  { %789 = vmatprep.subr.bf16.mxu1 %v950_v0 }
  0x2a   :  { %770 = vmatpush3.bf16.msra.mxu0 %v852_v4 }
  0x2b   :  { %771 = vmatprep.subr.bf16.mxu0 %v950_v0  ;;  %790 = vmatpush3.bf16.msra.mxu1 %v861_v28 }
  0x2c   :  { %791 = vmatprep.subr.bf16.mxu1 %v950_v0 }
  0x2e   :  { %772 = vmatpush3.bf16.msra.mxu0 %v853_v5 }
  0x2f   :  { %773 = vmatprep.subr.bf16.mxu0 %v950_v0  ;;  %792 = vmatpush3.bf16.msra.mxu1 %v862_v29 }
  0x30   :  { %793 = vmatprep.subr.bf16.mxu1 %v950_v0 }
  0x32   :  { %774 = vmatpush3.bf16.msra.mxu0 %v854_v6  ;;  %v866_v6 = vld [vmem:[%s1168_s3 + $0x78] sm:$0xff]  }
  0x33   :  { %775 = vmatprep.subr.bf16.mxu0 %v950_v0  ;;  %794 = vmatpush3.bf16.msra.mxu1 %v863_v30  ;;  %v689_v30 = vld [vmem:[%s1170_s5 + $0x1] ss:$0 sm:$0xff] }
  0x34   :  { %795 = vmatprep.subr.bf16.mxu1 %v950_v0 }
  0x36   :  { %776 = vmatpush3.bf16.msra.mxu0 %v855_v7 }
  0x37   :  { %777 = vmatprep.subr.bf16.mxu0 %v950_v0  ;;  %796 = vmatpush3.bf16.msra.mxu1 %v864_v31 }
  0x38   :  { %797 = vmatprep.subr.bf16.mxu1 %v950_v0 }
  0x3a   :  { %778 = vmatpush3.bf16.msra.mxu0 %v856_v8 }
  0x3b   :  { %803 = vmatprep.subr.bf16.mxu0 %v950_v0  ;;  %798 = vmatpush3.bf16.msra.mxu1 %v865_v32 }
  0x3c   :  { %823 = vmatprep.subr.bf16.mxu1 %v950_v0 }
  0x3d   :  { %780 = vmatmul.mubr.bf16.vlgmr.msra.gmra.mxu0 %v857_v9 }
  0x3e   :  { %819 = vmatprep.mubr.msk.bf16.mxu0 %vm951_vm0, %v950_v0  ;;  %804 = vmatpush3.bf16.msra.mxu0 %v866_v6  ;;  %v877_v6 = vld [vmem:[#allocation4 + $0x20] sm:$0xff]  }
  0x3f   :  { %805 = vmatprep.subr.bf16.mxu0 %v950_v0 }
  0xfd   :  { %v180_v11 = vpop.f32.mrf.mxu0 }
  0xfe   :  { %v1040_v12 = vadd.f32 %v668_v10, %v180_v11 }
  0xff   :  { %v781_v13 = vpop.f32.mrf.mxu0 }
 0x100   :  { %189 = vadd.xlane.f32.xlu0 %v1040_v12 }
 0x101   :  { %v183_v14 = vpop.f32.mrf.mxu0 }
 0x102   :  { %v1043_v15 = vadd.f32 %v668_v10, %v183_v14 }
 0x103   :  { %v782_v16 = vpop.f32.mrf.mxu0 }
 0x104   :  { %191 = vadd.xlane.f32.xlu0 %v1043_v15  ;;  %v868_v16 = vld [vmem:[%s1168_s3 + $0x68] sm:$0xff]  }
 0x189   :  { %v190_v18 = vpop.xlane.xlu0 %189 }
 0x18a   :  { %v194_v19 = vmul.f32 0.0078125, %v190_v18  ;;  %v870_v18 = vld [vmem:[%s1168_s3 + $0x58] sm:$0xff]  }
 0x18c   :  { %v196_v20 = vsub.f32 %v1040_v12, %v194_v19  ;;  %v871_v19 = vld [vmem:[%s1168_s3 + $0x50] sm:$0xff]  }
 0x18d   :  { %v192_v21 = vpop.xlane.xlu0 %191 }
 0x18e   :  { %v195_v22 = vmul.f32 0.0078125, %v192_v21  ;;  %v198_v23 = vmul.f32 %v196_v20, %v196_v20  ;;  %v873_v21 = vld [vmem:[%s1168_s3 + $0x40] sm:$0xff]  }
 0x190   :  { %v197_v24 = vsub.f32 %v1043_v15, %v195_v22  ;;  %200 = vadd.xlane.f32.xlu1 %v198_v23 }
 0x192   :  { %v199_v25 = vmul.f32 %v197_v24, %v197_v24 }
 0x194   :  { %202 = vadd.xlane.f32.xlu1 %v199_v25 }
 0x219   :  { %v201_v33 = vpop.xlane.xlu1 %200 }
 0x21a   :  { %v204_v34 = vmul.f32 0.0078125, %v201_v33 }
 0x21c   :  { %v206_v35 = vadd.f32 1e-05, %v204_v34  ;;  %v690_v34 = vld [vmem:[%s1171_s6 + $0x1] ss:$0 sm:$0xff] }
 0x21d   :  { %v203_v36 = vpop.xlane.xlu1 %202 }
 0x21e   :  { %882 = vrsqrt.f32 %v206_v35  ;;  %v205_v37 = vmul.f32 0.0078125, %v203_v36 }
 0x220   :  { %v207_v38 = vadd.f32 1e-05, %v205_v37 }
 0x222   :  { %884 = vrsqrt.f32 %v207_v38 }
 0x22b   :  { %v883_v39 = vpop.eup %882 }
 0x22c   :  { %v210_v40 = vmul.f32 %v883_v39, %v196_v20  ;;  %v872_v20 = vld [vmem:[%s1168_s3 + $0x48] sm:$0xff]   ;;  %v707_v39 = vld [vmem:[%s1169_s4 + $0x1] ss:$0 sm:$0xff] }
 0x22e   :  { %v216_v44 = vmul.f32 %v678_v41, %v210_v40 }
 0x22f   :  { %v885_v42 = vpop.eup %884 }
 0x230   :  { %v211_v43 = vmul.f32 %v885_v42, %v197_v24  ;;  %v222_v47 = vadd.f32 %v679_v45, %v216_v44 }
 0x232   :  { %v217_v46 = vmul.f32 %v678_v41, %v211_v43 }
 0x234   :  { %v223_v48 = vadd.f32 %v679_v45, %v217_v46 }
 0x236   :  { %v224_v49 = vpack.c.bf16 %v223_v48, %v222_v47 }
 0x238   :  { %800 = vmatmul.mubr.bf16.vlgmr.msra.gmra.mxu1 %v224_v49 }
 0x239   :  { %839 = vmatprep.mubr.msk.bf16.mxu1 %vm951_vm0, %v950_v0 }
 0x2f8   :  { %v328_v51 = vpop.f32.mrf.mxu1 }
 0x2f9   :  { %v329_v52 = vadd.f32 %v680_v50, %v328_v51 }
 0x2fa   :  { %v801_v53 = vpop.f32.mrf.mxu1 }
 0x2fb   :  { %v337_v54 = vmul.f32 0.70710677, %v329_v52  ;;  %v335_v60 = vmul.f32 0.5, %v329_v52 }
 0x2fc   :  { %v331_v55 = vpop.f32.mrf.mxu1 }
 0x2fd   :  { %886 = verf.f32 %v337_v54  ;;  %v332_v56 = vadd.f32 %v680_v50, %v331_v55 }
 0x2fe   :  { %v802_v57 = vpop.f32.mrf.mxu1 }
 0x2ff   :  { %v338_v58 = vmul.f32 0.70710677, %v332_v56  ;;  %v336_v1 = vmul.f32 0.5, %v332_v56 }
 0x301   :  { %888 = verf.f32 %v338_v58  ;;  %v874_v58 = vld [vmem:[#allocation4 + $0x38] sm:$0xff]  }
 0x302   :  { %824 = vmatpush3.bf16.msra.mxu1 %v874_v58 }
 0x303   :  { %825 = vmatprep.subr.bf16.mxu1 %v950_v0 }
 0x30a   :  { %v887_v59 = vpop.eup %886 }
 0x30b   :  { %v341_v61 = vadd.f32 1.0, %v887_v59 }
 0x30d   :  { %v343_v62 = vmul.f32 %v341_v61, %v335_v60 }
 0x30e   :  { %v889_v63 = vpop.eup %888 }
 0x30f   :  { %v342_v2 = vadd.f32 1.0, %v889_v63  ;;  %v1092_v3 = vadd.f32 %v343_v62, %v1040_v12 }
 0x311   :  { %v344_v4 = vmul.f32 %v342_v2, %v336_v1  ;;  %349 = vadd.xlane.f32.xlu0 %v1092_v3 }
 0x313   :  { %v1096_v5 = vadd.f32 %v344_v4, %v1043_v15  ;;  %v867_v15 = vld [vmem:[%s1168_s3 + $0x70] sm:$0xff]  }
 0x314   :  { %806 = vmatpush3.bf16.msra.mxu0 %v867_v15 }
 0x315   :  { %351 = vadd.xlane.f32.xlu1 %v1096_v5  ;;  %807 = vmatprep.subr.bf16.mxu0 %v950_v0 }
 0x318   :  { %808 = vmatpush3.bf16.msra.mxu0 %v868_v16 }
 0x319   :  { %809 = vmatprep.subr.bf16.mxu0 %v950_v0 }
 0x31c   :  { %810 = vmatpush3.bf16.msra.mxu0 %v869_v17 }
 0x31d   :  { %811 = vmatprep.subr.bf16.mxu0 %v950_v0 }
 0x320   :  { %812 = vmatpush3.bf16.msra.mxu0 %v870_v18 }
 0x321   :  { %813 = vmatprep.subr.bf16.mxu0 %v950_v0 }
 0x324   :  { %814 = vmatpush3.bf16.msra.mxu0 %v871_v19  ;;  %v716_v19 = vld [vmem:[%s1172_s7] ss:$0 sm:$0xff] }
 0x325   :  { %815 = vmatprep.subr.bf16.mxu0 %v950_v0 }
 0x328   :  { %816 = vmatpush3.bf16.msra.mxu0 %v872_v20 }
 0x329   :  { %817 = vmatprep.subr.bf16.mxu0 %v950_v0 }
 0x32c   :  { %818 = vmatpush3.bf16.msra.mxu0 %v873_v21 }
 0x39a   :  { %v350_v7 = vpop.xlane.xlu0 %349 }
 0x39b   :  { %v353_v8 = vmul.f32 0.0078125, %v350_v7  ;;  %v878_v7 = vld [vmem:[#allocation4 + $0x18] sm:$0xff]  }
 0x39d   :  { %v355_v9 = vsub.f32 %v1092_v3, %v353_v8  ;;  %v879_v8 = vld [vmem:[#allocation4 + $0x10] sm:$0xff]  }
 0x39e   :  { %v352_v10 = vpop.xlane.xlu1 %351 }
 0x39f   :  { %v354_v11 = vmul.f32 0.0078125, %v352_v10  ;;  %v357_v12 = vmul.f32 %v355_v9, %v355_v9  ;;  %v881_v10 = vld [vmem:[#allocation4] sm:$0xff]  }
 0x3a1   :  { %v356_v13 = vsub.f32 %v1096_v5, %v354_v11  ;;  %359 = vadd.xlane.f32.xlu0 %v357_v12 }
 0x3a3   :  { %v358_v14 = vmul.f32 %v356_v13, %v356_v13 }
 0x3a5   :  { %361 = vadd.xlane.f32.xlu1 %v358_v14 }
 0x42a   :  { %v360_v22 = vpop.xlane.xlu0 %359 }
 0x42b   :  { %v363_v23 = vmul.f32 0.0078125, %v360_v22 }
 0x42d   :  { %v365_v24 = vadd.f32 1e-05, %v363_v23 }
 0x42e   :  { %v362_v25 = vpop.xlane.xlu1 %361 }
 0x42f   :  { %890 = vrsqrt.f32 %v365_v24  ;;  %v364_v26 = vmul.f32 0.0078125, %v362_v25 }
 0x431   :  { %v366_v27 = vadd.f32 1e-05, %v364_v26 }
 0x433   :  { %892 = vrsqrt.f32 %v366_v27  ;;  %v718_v27 = vld [vmem:[%s1175_s10] ss:$0 sm:$0xff] }
 0x43c   :  { %v891_v28 = vpop.eup %890 }
 0x43d   :  { %v369_v29 = vmul.f32 %v891_v28, %v355_v9  ;;  %v880_v9 = vld [vmem:[#allocation4 + $0x8] sm:$0xff]  }
 0x43f   :  { %v375_v33 = vmul.f32 %v689_v30, %v369_v29 }
 0x440   :  { %v893_v31 = vpop.eup %892 }
 0x441   :  { %v370_v32 = vmul.f32 %v893_v31, %v356_v13  ;;  %v381_v36 = vadd.f32 %v690_v34, %v375_v33 }
 0x443   :  { %v376_v35 = vmul.f32 %v689_v30, %v370_v32 }
 0x445   :  { %v382_v37 = vadd.f32 %v690_v34, %v376_v35 }
 0x447   :  { %v383_v38 = vpack.c.bf16 %v382_v37, %v381_v36 }
 0x449   :  { %820 = vmatmul.mubr.bf16.vlgmr.msra.gmra.mxu0 %v383_v38 }
 0x509   :  { %v488_v40 = vpop.f32.mrf.mxu0 }
 0x50a   :  { %v489_v41 = vadd.f32 %v707_v39, %v488_v40 }
 0x50b   :  { %v821_v42 = vpop.f32.mrf.mxu0 }
 0x50c   :  { %v497_v43 = vmul.f32 0.70710677, %v489_v41  ;;  %v495_v49 = vmul.f32 0.5, %v489_v41 }
 0x50d   :  { %v491_v44 = vpop.f32.mrf.mxu0 }
 0x50e   :  { %894 = verf.f32 %v497_v43  ;;  %v492_v45 = vadd.f32 %v707_v39, %v491_v44 }
 0x50f   :  { %v822_v46 = vpop.f32.mrf.mxu0 }
 0x510   :  { %v498_v47 = vmul.f32 0.70710677, %v492_v45  ;;  %v496_v53 = vmul.f32 0.5, %v492_v45 }
 0x512   :  { %896 = verf.f32 %v498_v47 }
 0x51b   :  { %v895_v48 = vpop.eup %894 }
 0x51c   :  { %v501_v50 = vadd.f32 1.0, %v895_v48 }
 0x51e   :  { %v503_v51 = vmul.f32 %v501_v50, %v495_v49 }
 0x51f   :  { %v897_v52 = vpop.eup %896 }
 0x520   :  { %v505_v54 = vadd.f32 %v503_v51, %v1092_v3  ;;  %v502_v55 = vadd.f32 1.0, %v897_v52  ;;  %v875_v3 = vld [vmem:[#allocation4 + $0x30] sm:$0xff]  }
 0x521   :  { %826 = vmatpush3.bf16.msra.mxu1 %v875_v3 }
 0x522   :  { %509 = vadd.xlane.f32.xlu0 %v505_v54  ;;  %v504_v56 = vmul.f32 %v502_v55, %v496_v53  ;;  %827 = vmatprep.subr.bf16.mxu1 %v950_v0 }
 0x524   :  { %v506_v57 = vadd.f32 %v504_v56, %v1096_v5  ;;  %v876_v5 = vld [vmem:[#allocation4 + $0x28] sm:$0xff]  }
 0x525   :  { %828 = vmatpush3.bf16.msra.mxu1 %v876_v5 }
 0x526   :  { %511 = vadd.xlane.f32.xlu1 %v506_v57  ;;  %829 = vmatprep.subr.bf16.mxu1 %v950_v0 }
 0x529   :  { %830 = vmatpush3.bf16.msra.mxu1 %v877_v6 }
 0x52a   :  { %831 = vmatprep.subr.bf16.mxu1 %v950_v0 }
 0x52d   :  { %832 = vmatpush3.bf16.msra.mxu1 %v878_v7 }
 0x52e   :  { %833 = vmatprep.subr.bf16.mxu1 %v950_v0 }
 0x531   :  { %834 = vmatpush3.bf16.msra.mxu1 %v879_v8 }
 0x532   :  { %835 = vmatprep.subr.bf16.mxu1 %v950_v0 }
 0x535   :  { %836 = vmatpush3.bf16.msra.mxu1 %v880_v9 }
 0x536   :  { %837 = vmatprep.subr.bf16.mxu1 %v950_v0  ;;  %v717_v0 = vld [vmem:[%s1173_s8] ss:$0 sm:$0xff] }
 0x539   :  { %838 = vmatpush3.bf16.msra.mxu1 %v881_v10 }
 0x5ab   :  { %v510_v59 = vpop.xlane.xlu0 %509 }
 0x5ac   :  { %v513_v60 = vmul.f32 0.0078125, %v510_v59 }
 0x5ae   :  { %v515_v61 = vsub.f32 %v505_v54, %v513_v60 }
 0x5af   :  { %v512_v62 = vpop.xlane.xlu1 %511 }
 0x5b0   :  { %v514_v63 = vmul.f32 0.0078125, %v512_v62  ;;  %v517_v1 = vmul.f32 %v515_v61, %v515_v61 }
 0x5b2   :  { %v516_v2 = vsub.f32 %v506_v57, %v514_v63  ;;  %519 = vadd.xlane.f32.xlu0 %v517_v1 }
 0x5b4   :  { %v518_v4 = vmul.f32 %v516_v2, %v516_v2 }
 0x5b6   :  { %521 = vadd.xlane.f32.xlu1 %v518_v4 }
 0x63b   :  { %v520_v11 = vpop.xlane.xlu0 %519 }
 0x63c   :  { %v523_v12 = vmul.f32 0.0078125, %v520_v11 }
 0x63e   :  { %v525_v13 = vadd.f32 1e-05, %v523_v12 }
 0x63f   :  { %v522_v14 = vpop.xlane.xlu1 %521 }
 0x640   :  { %898 = vrsqrt.f32 %v525_v13  ;;  %v524_v15 = vmul.f32 0.0078125, %v522_v14 }
 0x642   :  { %v526_v16 = vadd.f32 1e-05, %v524_v15 }
 0x644   :  { %900 = vrsqrt.f32 %v526_v16 }
 0x64d   :  { %v899_v17 = vpop.eup %898 }
 0x64e   :  { %v529_v18 = vmul.f32 %v899_v17, %v515_v61 }
 0x650   :  { %v537_v22 = vmul.f32 %v716_v19, %v529_v18 }
 0x651   :  { %v901_v20 = vpop.eup %900 }
 0x652   :  { %v530_v21 = vmul.f32 %v901_v20, %v516_v2  ;;  %v545_v24 = vadd.f32 %v717_v0, %v537_v22 }
 0x654   :  { %v538_v23 = vmul.f32 %v716_v19, %v530_v21 }
 0x656   :  { %v546_v25 = vadd.f32 %v717_v0, %v538_v23 }
 0x658   :  { %v547_v26 = vpack.c.bf16 %v546_v25, %v545_v24 }
 0x65a   :  { %840 = vmatmul.mubr.bf16.vlgmr.msra.gmra.mxu1 %v547_v26 }
 0x71a   :  { %v653_v28 = vpop.f32.mrf.mxu1 }
 0x71b   :  { %v654_v29 = vadd.f32 %v718_v27, %v653_v28 }
 0x71c   :  { %v841_v30 = vpop.f32.mrf.mxu1 }
 0x71d   :  { %660 = vst [vmem:[%s1176_s11] sm:$0xff] %v654_v29 }
 0x71e   :  { %v656_v31 = vpop.f32.mrf.mxu1 }
 0x71f   :  { %v657_v32 = vadd.f32 %v718_v27, %v656_v31 }
 0x720   :  { %v842_v33 = vpop.f32.mrf.mxu1 }
 0x721   :  { %661 = vst [vmem:[%s1176_s11 + $0x8] sm:$0xff] %v657_v32 }
 0x722   :  { %666 = vsyncpa [#allocation3], 1 }
 0x723   :  { %667 = vsyncpa [#allocation5], 1 }

</bundles_post_ra>
